<compile_context>
chip_gen: v5e
topology: v5e:2x2
jax: 0.10.0
libtpu: 0.0.40
codegen_flags: <defaults>
</compile_context>

<pallas_src>
import functools

import jax
import jax.numpy as jnp
from jax.experimental import pallas as pl
from jax.experimental.pallas import tpu as pltpu

# ---------------------------------------------------------------------------
# Synthetic gc.CmdTypes constants (minirts convention). These stand in for the
# game-constants module imported by the original script.
# ---------------------------------------------------------------------------
CMD_IDLE = 0
CMD_CONT = 1
CMD_GATHER = 2
CMD_ATTACK = 3
CMD_BUILD_BUILDING = 4
CMD_BUILD_UNIT = 5
CMD_MOVE = 6
NUM_CMD_TYPE = 7

_HI = jax.lax.Precision.HIGHEST


def _round_up(n, m):
    return ((n + m - 1) // m) * m


# ---------------------------------------------------------------------------
# Pallas kernel: one grid step == one tile of TB batch elements.
# ---------------------------------------------------------------------------
def _cmd_embedding_kernel(idx_ref, xy_ref, er_ref, wbig_ref, wer_ref,
                          out_ref, *, NC, NT, NE):
    # idx_ref : [TB, P, 4]  int32 (cmd_type, target_type, attack_idx, gather_idx)
    # xy_ref  : [TB, P, 2]  f32
    # er_ref  : [TB, NE+NR, Fe]  fused enemy/resource rows (+ bias carriers)
    # wbig_ref: [Kp, 4A]    block-diagonal shared weights (cmd|tgt|xy|xy-bias)
    # wer_ref : [Fe, 4A]    fused enemy/resource projection into lanes [3A,4A)
    # out_ref : [TB, P, 4A]
    TB, P, _ = idx_ref.shape
    NEPR = er_ref.shape[1]
    Fe = er_ref.shape[2]
    Kp = wbig_ref.shape[0]
    A4 = wbig_ref.shape[1]
    f32 = jnp.float32

    # Load the packed index / xy streams once; reuse the registers for all
    # compares and one-hots (avoids repeated lane-sparse loads).
    idx = idx_ref[...]
    xy = xy_ref[...]
    cmd = idx[:, :, 0:1]          # [TB, P, 1]
    tgt = idx[:, :, 1:2]
    atk = idx[:, :, 2:3]
    gat = idx[:, :, 3:4]
    xv = xy[:, :, 0:1]
    yv = xy[:, :, 1:2]

    # Masks derived from cmd_type (equivalent to the scatter_-built one-hot).
    tgt_m = ((cmd == CMD_BUILD_BUILDING) | (cmd == CMD_BUILD_UNIT)).astype(f32)
    xy_m = ((cmd == CMD_BUILD_BUILDING) | (cmd == CMD_MOVE)).astype(f32)
    atk_m = (cmd == CMD_ATTACK).astype(f32)
    gat_m = (cmd == CMD_GATHER).astype(f32)

    # Fused lane-dense input for the block-diagonal matmul, built with pure
    # VPU iota compares (no lane concatenation):
    #   cols [0, NC)          : one_hot(cmd)
    #   cols [NC, NC+NT)      : tgt_mask * one_hot(tgt)
    #   col  NC+NT            : xy_mask * x
    #   col  NC+NT+1          : xy_mask * y
    #   col  NC+NT+2          : xy_mask        (carries the xy bias row)
    col = jax.lax.broadcasted_iota(jnp.int32, (TB, P, Kp), 2)
    x_in = ((col == cmd).astype(f32)
            + ((col - NC) == tgt).astype(f32) * tgt_m
            + (col == (NC + NT)).astype(f32) * (xv * xy_m)
            + (col == (NC + NT + 1)).astype(f32) * (yv * xy_m)
            + (col == (NC + NT + 2)).astype(f32) * xy_m)

    # One MXU matmul produces output columns [0, 3A) already in place;
    # columns [3A, 4A) of wbig are zero.
    main = jnp.dot(x_in.reshape(TB * P, Kp), wbig_ref[...],
                   preferred_element_type=f32, precision=_HI)
    main = main.reshape(TB, P, A4)

    # Fused enemy/resource projection (single matmul, biases carried as
    # indicator columns); result lives only in output lanes [3A, 4A).
    er_proj = jnp.dot(er_ref[...].reshape(TB * NEPR, Fe), wer_ref[...],
                      preferred_element_type=f32, precision=_HI)
    er_proj = er_proj.reshape(TB, NEPR, A4)

    # Target gather as a masked one-hot batched matmul.
    # Note: out-of-range / sentinel indices (e.g. -1) yield zeros here, while
    # torch.gather would clamp/error — valid indices are assumed (as in the
    # module's contract).
    ecol = jax.lax.broadcasted_iota(jnp.int32, (TB, P, NEPR), 2)
    sel_oh = ((ecol == atk).astype(f32) * atk_m
              + ((ecol - NE) == gat).astype(f32) * gat_m)
    sel = jnp.einsum("bpe,bea->bpa", sel_oh, er_proj,
                     preferred_element_type=f32, precision=_HI)

    # Single lane-dense [TB, P, 4A] store (no concat, no masked sub-stores).
    out_ref[...] = main + sel


# ---------------------------------------------------------------------------
# Wrapper
# ---------------------------------------------------------------------------
def advanced_cmd_embedding(num_real_unit, cmd_type, target_type, x, y,
                           target_attack_idx, target_gather_idx,
                           enemy_feat, resource_feat, params,
                           *, batch_tile=None):
    del num_real_unit  # unused by the forward pass (same as the PyTorch module)
    B, P = cmd_type.shape
    NE, F = enemy_feat.shape[1], enemy_feat.shape[2]
    NR = resource_feat.shape[1]
    NC, A = params["cmd_tab"].shape
    NT = params["tgt_tab"].shape[0]
    A4 = 4 * A
    NEPR = NE + NR

    # ---- host-side weight packing (layout plumbing, done once per call) ----
    Kp = _round_up(NC + NT + 3, 8)
    Fe = _round_up(2 * F + 2, 8)

    w_big = jnp.zeros((Kp, A4), jnp.float32)
    w_big = w_big.at[0:NC, 0:A].set(params["cmd_tab"])
    w_big = w_big.at[NC:NC + NT, A:2 * A].set(params["tgt_tab"])
    w_big = w_big.at[NC + NT:NC + NT + 2, 2 * A:3 * A].set(params["w_xy"])
    w_big = w_big.at[NC + NT + 2, 2 * A:3 * A].set(params["b_xy"][0])

    w_er = jnp.zeros((Fe, A4), jnp.float32)
    w_er = w_er.at[0:F, 3 * A:].set(params["w_e"])
    w_er = w_er.at[F:2 * F, 3 * A:].set(params["w_r"])
    w_er = w_er.at[2 * F, 3 * A:].set(params["b_e"][0])
    w_er = w_er.at[2 * F + 1, 3 * A:].set(params["b_r"][0])

    # ---- host-side input packing ----
    idx = jnp.stack([cmd_type, target_type, target_attack_idx,
                     target_gather_idx], axis=-1).astype(jnp.int32)   # [B,P,4]
    xy = jnp.stack([x, y], axis=-1).astype(jnp.float32)               # [B,P,2]

    ef = enemy_feat.astype(jnp.float32)
    rf = resource_feat.astype(jnp.float32)
    e_rows = jnp.concatenate(
        [ef, jnp.zeros((B, NE, F), jnp.float32),
         jnp.ones((B, NE, 1), jnp.float32),
         jnp.zeros((B, NE, 1), jnp.float32)], axis=-1)
    r_rows = jnp.concatenate(
        [jnp.zeros((B, NR, F), jnp.float32), rf,
         jnp.zeros((B, NR, 1), jnp.float32),
         jnp.ones((B, NR, 1), jnp.float32)], axis=-1)
    er = jnp.concatenate([e_rows, r_rows], axis=1)          # [B, NE+NR, 2F+2]
    er = jnp.pad(er, ((0, 0), (0, 0), (0, Fe - (2 * F + 2))))

    # ---- batch tiling ----
    if batch_tile is None:
        batch_tile = max(1, min(B, -(-128 // P)))   # target M = TB*P ~ 128
    TB = int(batch_tile)
    nb = -(-B // TB)
    Bp = nb * TB
    if Bp != B:
        pad_b = Bp - B
        idx = jnp.pad(idx, ((0, pad_b), (0, 0), (0, 0)))
        xy = jnp.pad(xy, ((0, pad_b), (0, 0), (0, 0)))
        er = jnp.pad(er, ((0, pad_b), (0, 0), (0, 0)))

    kernel = functools.partial(_cmd_embedding_kernel, NC=NC, NT=NT, NE=NE)

    out = pl.pallas_call(
        kernel,
        out_shape=jax.ShapeDtypeStruct((Bp, P, A4), jnp.float32),
        grid_spec=pltpu.PrefetchScalarGridSpec(
            num_scalar_prefetch=0,
            grid=(nb,),
            in_specs=[
                pl.BlockSpec((TB, P, 4), lambda b: (b, 0, 0)),
                pl.BlockSpec((TB, P, 2), lambda b: (b, 0, 0)),
                pl.BlockSpec((TB, NEPR, Fe), lambda b: (b, 0, 0)),
                pl.BlockSpec((Kp, A4), lambda b: (0, 0)),    # resident weights
                pl.BlockSpec((Fe, A4), lambda b: (0, 0)),    # resident weights
            ],
            out_specs=pl.BlockSpec((TB, P, A4), lambda b: (b, 0, 0)),
        ),
        compiler_params=pltpu.CompilerParams(
            dimension_semantics=("parallel",)),
    )(idx, xy, er, w_big, w_er)
    return out[:B]


# ---------------------------------------------------------------------------
# Pure-JAX reference (mirrors the PyTorch forward, f32)
# ---------------------------------------------------------------------------
def reference(cmd_type, target_type, x, y, atk_idx, gat_idx,
              enemy_feat, resource_feat, params):
    A = params["cmd_tab"].shape[1]
    cmd_emb = params["cmd_tab"][cmd_type]                    # [B, P, A]
    tgt_emb = params["tgt_tab"][target_type]                 # [B, P, A]
    xy = jnp.stack([x, y], axis=-1)
    xy_feat = jnp.matmul(xy, params["w_xy"], precision=_HI) + params["b_xy"][0]
    e_proj = jnp.matmul(enemy_feat, params["w_e"], precision=_HI) + params["b_e"][0]
    r_proj = jnp.matmul(resource_feat, params["w_r"], precision=_HI) + params["b_r"][0]
    sel_e = jnp.take_along_axis(e_proj, atk_idx[:, :, None], axis=1)[:, :, :A]
    sel_r = jnp.take_along_axis(r_proj, gat_idx[:, :, None], axis=1)[:, :, :A]

    f = lambda c: (cmd_type == c).astype(jnp.float32)[..., None]
    bb, bu, mv, atk, gat = f(CMD_BUILD_BUILDING), f(CMD_BUILD_UNIT), f(CMD_MOVE), \
        f(CMD_ATTACK), f(CMD_GATHER)
    return jnp.concatenate(
        [cmd_emb, (bb + bu) * tgt_emb, (bb + mv) * xy_feat,
         atk * sel_e + gat * sel_r], axis=-1)


def weight_norm_effective(v, g):
    # torch weight_norm(dim=None): W = g * v / ||v||_F   (g scalar)
    return g * v / jnp.sqrt(jnp.sum(v * v))


if __name__ == "__main__":
    # Small, forward-consistent shapes.
    B, P = 8, 8            # batch, num_padded_unit
    A = 32                 # attribute_dim  -> out_dim = 128 (lane-dense)
    F = 16                 # target_feat_dim
    NC = NUM_CMD_TYPE      # num_cmd_type
    NT = 16                # num_target_type
    NE, NR = 8, 8          # num_padded_enemy / num_padded_resource

    key = jax.random.PRNGKey(0)
    ks = jax.random.split(key, 20)

    # Deterministic parameter init (weight_norm is folded into the effective W).
    params = {
        "cmd_tab": jax.random.normal(ks[0], (NC, A), jnp.float32),
        "tgt_tab": jax.random.normal(ks[1], (NT, A), jnp.float32),
        "w_xy": weight_norm_effective(
            jax.random.normal(ks[2], (A, 2), jnp.float32) * 0.5,
            jnp.float32(1.3)).T,                                  # [2, A]
        "b_xy": (jax.random.normal(ks[3], (1, A), jnp.float32) * 0.1),
        "w_e": weight_norm_effective(
            jax.random.normal(ks[4], (A, F), jnp.float32) * 0.2,
            jnp.float32(0.9)).T,                                  # [F, A]
        "b_e": (jax.random.normal(ks[5], (1, A), jnp.float32) * 0.1),
        "w_r": weight_norm_effective(
            jax.random.normal(ks[6], (A, F), jnp.float32) * 0.2,
            jnp.float32(1.1)).T,                                  # [F, A]
        "b_r": (jax.random.normal(ks[7], (1, A), jnp.float32) * 0.1),
    }

    # Deterministic example inputs.
    cmd_type = jax.random.randint(ks[8], (B, P), 0, NC, jnp.int32)
    target_type = jax.random.randint(ks[9], (B, P), 0, NT, jnp.int32)
    x = jax.random.uniform(ks[10], (B, P), jnp.float32)
    y = jax.random.uniform(ks[11], (B, P), jnp.float32)
    target_attack_idx = jax.random.randint(ks[12], (B, P), 0, NE, jnp.int32)
    target_gather_idx = jax.random.randint(ks[13], (B, P), 0, NR, jnp.int32)
    enemy_feat = jax.random.normal(ks[14], (B, NE, F), jnp.float32)
    resource_feat = jax.random.normal(ks[15], (B, NR, F), jnp.float32)
    num_real_unit = jnp.full((B,), P, jnp.int32)  # unused by forward (as in torch)

    out = advanced_cmd_embedding(num_real_unit, cmd_type, target_type, x, y,
                                 target_attack_idx, target_gather_idx,
                                 enemy_feat, resource_feat, params,
                                 batch_tile=4)   # 2 grid steps (even split / v7x)
    out = jax.block_until_ready(out)

    ref = reference(cmd_type, target_type, x, y,
                    target_attack_idx, target_gather_idx,
                    enemy_feat, resource_feat, params)

    assert out.shape == (B, P, 4 * A), out.shape
    assert jnp.allclose(out, ref, rtol=1e-4, atol=1e-4), \
        float(jnp.max(jnp.abs(out - ref)))
    print("KERNEL_OK")
</pallas_src>

<mosaic_0001>
module attributes {stable_mosaic.version = 11 : i64} {
  func.func @_cmd_embedding_kernel(%arg0: i32, %arg1: memref<4x8x4xi32, #tpu.memory_space<vmem>>, %arg2: memref<4x8x2xf32, #tpu.memory_space<vmem>>, %arg3: memref<4x16x40xf32, #tpu.memory_space<vmem>>, %arg4: memref<32x128xf32, #tpu.memory_space<vmem>>, %arg5: memref<40x128xf32, #tpu.memory_space<vmem>>, %arg6: memref<4x8x128xf32, #tpu.memory_space<vmem>>) attributes {dimension_semantics = [#tpu.dimension_semantics<parallel>], iteration_bounds = array<i64: 2>, scalar_prefetch = 0 : i64, scratch_operands = 0 : i64, tpu.core_type = #tpu.core_type<tc>, window_params = [{transform_indices = @transform_0, window_bounds = array<i64: 4, 8, 4>}, {transform_indices = @transform_1, window_bounds = array<i64: 4, 8, 2>}, {transform_indices = @transform_2, window_bounds = array<i64: 4, 16, 40>}, {pipeline_mode = #tpu.pipeline_mode<synchronous>, transform_indices = @transform_3, window_bounds = array<i64: 32, 128>}, {pipeline_mode = #tpu.pipeline_mode<synchronous>, transform_indices = @transform_4, window_bounds = array<i64: 40, 128>}, {transform_indices = @transform_5, window_bounds = array<i64: 4, 8, 128>}]} {
    %c0 = arith.constant 0 : index
    %c0_0 = arith.constant 0 : index
    %c0_1 = arith.constant 0 : index
    %0 = vector.load %arg1[%c0, %c0_0, %c0_1] : memref<4x8x4xi32, #tpu.memory_space<vmem>>, vector<4x8x4xi32>
    %c0_2 = arith.constant 0 : index
    %c0_3 = arith.constant 0 : index
    %c0_4 = arith.constant 0 : index
    %1 = vector.load %arg2[%c0_2, %c0_3, %c0_4] : memref<4x8x2xf32, #tpu.memory_space<vmem>>, vector<4x8x2xf32>
    %2 = vector.extract_strided_slice %0 {offsets = [0, 0, 0], sizes = [4, 8, 1], strides = [1, 1, 1]} : vector<4x8x4xi32> to vector<4x8x1xi32>
    %3 = vector.extract_strided_slice %0 {offsets = [0, 0, 1], sizes = [4, 8, 1], strides = [1, 1, 1]} : vector<4x8x4xi32> to vector<4x8x1xi32>
    %4 = vector.extract_strided_slice %0 {offsets = [0, 0, 2], sizes = [4, 8, 1], strides = [1, 1, 1]} : vector<4x8x4xi32> to vector<4x8x1xi32>
    %5 = vector.extract_strided_slice %0 {offsets = [0, 0, 3], sizes = [4, 8, 1], strides = [1, 1, 1]} : vector<4x8x4xi32> to vector<4x8x1xi32>
    %6 = vector.extract_strided_slice %1 {offsets = [0, 0, 0], sizes = [4, 8, 1], strides = [1, 1, 1]} : vector<4x8x2xf32> to vector<4x8x1xf32>
    %7 = vector.extract_strided_slice %1 {offsets = [0, 0, 1], sizes = [4, 8, 1], strides = [1, 1, 1]} : vector<4x8x2xf32> to vector<4x8x1xf32>
    %c4_i32 = arith.constant 4 : i32
    %8 = vector.broadcast %c4_i32 : i32 to vector<4x8x1xi32>
    %9 = arith.cmpi eq, %2, %8 : vector<4x8x1xi32>
    %c5_i32 = arith.constant 5 : i32
    %10 = vector.broadcast %c5_i32 : i32 to vector<4x8x1xi32>
    %11 = arith.cmpi eq, %2, %10 : vector<4x8x1xi32>
    %12 = arith.ori %9, %11 : vector<4x8x1xi1>
    %13 = arith.extui %12 : vector<4x8x1xi1> to vector<4x8x1xi32>
    %14 = arith.sitofp %13 : vector<4x8x1xi32> to vector<4x8x1xf32>
    %c4_i32_5 = arith.constant 4 : i32
    %15 = vector.broadcast %c4_i32_5 : i32 to vector<4x8x1xi32>
    %16 = arith.cmpi eq, %2, %15 : vector<4x8x1xi32>
    %c6_i32 = arith.constant 6 : i32
    %17 = vector.broadcast %c6_i32 : i32 to vector<4x8x1xi32>
    %18 = arith.cmpi eq, %2, %17 : vector<4x8x1xi32>
    %19 = arith.ori %16, %18 : vector<4x8x1xi1>
    %20 = arith.extui %19 : vector<4x8x1xi1> to vector<4x8x1xi32>
    %21 = arith.sitofp %20 : vector<4x8x1xi32> to vector<4x8x1xf32>
    %c3_i32 = arith.constant 3 : i32
    %22 = vector.broadcast %c3_i32 : i32 to vector<4x8x1xi32>
    %23 = arith.cmpi eq, %2, %22 : vector<4x8x1xi32>
    %24 = arith.extui %23 : vector<4x8x1xi1> to vector<4x8x1xi32>
    %25 = arith.sitofp %24 : vector<4x8x1xi32> to vector<4x8x1xf32>
    %c2_i32 = arith.constant 2 : i32
    %26 = vector.broadcast %c2_i32 : i32 to vector<4x8x1xi32>
    %27 = arith.cmpi eq, %2, %26 : vector<4x8x1xi32>
    %28 = arith.extui %27 : vector<4x8x1xi1> to vector<4x8x1xi32>
    %29 = arith.sitofp %28 : vector<4x8x1xi32> to vector<4x8x1xf32>
    %30 = tpu.iota {dimensions = array<i32: 2>} : vector<4x8x32xi32>
    %31 = vector.broadcast %2 : vector<4x8x1xi32> to vector<4x8x32xi32>
    %32 = arith.cmpi eq, %30, %31 : vector<4x8x32xi32>
    %33 = arith.extui %32 : vector<4x8x32xi1> to vector<4x8x32xi32>
    %34 = arith.sitofp %33 : vector<4x8x32xi32> to vector<4x8x32xf32>
    %c7_i32 = arith.constant 7 : i32
    %35 = vector.broadcast %c7_i32 : i32 to vector<4x8x32xi32>
    %36 = arith.subi %30, %35 : vector<4x8x32xi32>
    %37 = vector.broadcast %3 : vector<4x8x1xi32> to vector<4x8x32xi32>
    %38 = arith.cmpi eq, %36, %37 : vector<4x8x32xi32>
    %39 = arith.extui %38 : vector<4x8x32xi1> to vector<4x8x32xi32>
    %40 = arith.sitofp %39 : vector<4x8x32xi32> to vector<4x8x32xf32>
    %41 = vector.broadcast %14 : vector<4x8x1xf32> to vector<4x8x32xf32>
    %42 = arith.mulf %40, %41 : vector<4x8x32xf32>
    %43 = arith.addf %34, %42 : vector<4x8x32xf32>
    %c23_i32 = arith.constant 23 : i32
    %44 = vector.broadcast %c23_i32 : i32 to vector<4x8x32xi32>
    %45 = arith.cmpi eq, %30, %44 : vector<4x8x32xi32>
    %46 = arith.extui %45 : vector<4x8x32xi1> to vector<4x8x32xi32>
    %47 = arith.sitofp %46 : vector<4x8x32xi32> to vector<4x8x32xf32>
    %48 = arith.mulf %6, %21 : vector<4x8x1xf32>
    %49 = vector.broadcast %48 : vector<4x8x1xf32> to vector<4x8x32xf32>
    %50 = arith.mulf %47, %49 : vector<4x8x32xf32>
    %51 = arith.addf %43, %50 : vector<4x8x32xf32>
    %c24_i32 = arith.constant 24 : i32
    %52 = vector.broadcast %c24_i32 : i32 to vector<4x8x32xi32>
    %53 = arith.cmpi eq, %30, %52 : vector<4x8x32xi32>
    %54 = arith.extui %53 : vector<4x8x32xi1> to vector<4x8x32xi32>
    %55 = arith.sitofp %54 : vector<4x8x32xi32> to vector<4x8x32xf32>
    %56 = arith.mulf %7, %21 : vector<4x8x1xf32>
    %57 = vector.broadcast %56 : vector<4x8x1xf32> to vector<4x8x32xf32>
    %58 = arith.mulf %55, %57 : vector<4x8x32xf32>
    %59 = arith.addf %51, %58 : vector<4x8x32xf32>
    %c25_i32 = arith.constant 25 : i32
    %60 = vector.broadcast %c25_i32 : i32 to vector<4x8x32xi32>
    %61 = arith.cmpi eq, %30, %60 : vector<4x8x32xi32>
    %62 = arith.extui %61 : vector<4x8x32xi1> to vector<4x8x32xi32>
    %63 = arith.sitofp %62 : vector<4x8x32xi32> to vector<4x8x32xf32>
    %64 = vector.broadcast %21 : vector<4x8x1xf32> to vector<4x8x32xf32>
    %65 = arith.mulf %63, %64 : vector<4x8x32xf32>
    %66 = arith.addf %59, %65 : vector<4x8x32xf32>
    %67 = vector.shape_cast %66 : vector<4x8x32xf32> to vector<32x32xf32>
    %c0_6 = arith.constant 0 : index
    %c0_7 = arith.constant 0 : index
    %68 = vector.load %arg4[%c0_6, %c0_7] : memref<32x128xf32, #tpu.memory_space<vmem>>, vector<32x128xf32>
    %cst = arith.constant dense<0.000000e+00> : vector<32x128xf32>
    %69 = tpu.matmul %67, %68, %cst {dimension_numbers = #tpu.dot_dimension_numbers<[1], [0], [0], [1], [0, 0, 1, 1], [], []>, precision = #tpu.contract_precision<fp32>} : vector<32x32xf32>, vector<32x128xf32>, vector<32x128xf32> -> vector<32x128xf32>
    %70 = vector.shape_cast %69 : vector<32x128xf32> to vector<4x8x128xf32>
    %c0_8 = arith.constant 0 : index
    %c0_9 = arith.constant 0 : index
    %c0_10 = arith.constant 0 : index
    %71 = vector.load %arg3[%c0_8, %c0_9, %c0_10] : memref<4x16x40xf32, #tpu.memory_space<vmem>>, vector<4x16x40xf32>
    %72 = vector.shape_cast %71 : vector<4x16x40xf32> to vector<64x40xf32>
    %c0_11 = arith.constant 0 : index
    %c0_12 = arith.constant 0 : index
    %73 = vector.load %arg5[%c0_11, %c0_12] : memref<40x128xf32, #tpu.memory_space<vmem>>, vector<40x128xf32>
    %cst_13 = arith.constant dense<0.000000e+00> : vector<64x128xf32>
    %74 = tpu.matmul %72, %73, %cst_13 {dimension_numbers = #tpu.dot_dimension_numbers<[1], [0], [0], [1], [0, 0, 1, 1], [], []>, precision = #tpu.contract_precision<fp32>} : vector<64x40xf32>, vector<40x128xf32>, vector<64x128xf32> -> vector<64x128xf32>
    %75 = vector.shape_cast %74 : vector<64x128xf32> to vector<4x16x128xf32>
    %76 = tpu.iota {dimensions = array<i32: 2>} : vector<4x8x16xi32>
    %77 = vector.broadcast %4 : vector<4x8x1xi32> to vector<4x8x16xi32>
    %78 = arith.cmpi eq, %76, %77 : vector<4x8x16xi32>
    %79 = arith.extui %78 : vector<4x8x16xi1> to vector<4x8x16xi32>
    %80 = arith.sitofp %79 : vector<4x8x16xi32> to vector<4x8x16xf32>
    %81 = vector.broadcast %25 : vector<4x8x1xf32> to vector<4x8x16xf32>
    %82 = arith.mulf %80, %81 : vector<4x8x16xf32>
    %c8_i32 = arith.constant 8 : i32
    %83 = vector.broadcast %c8_i32 : i32 to vector<4x8x16xi32>
    %84 = arith.subi %76, %83 : vector<4x8x16xi32>
    %85 = vector.broadcast %5 : vector<4x8x1xi32> to vector<4x8x16xi32>
    %86 = arith.cmpi eq, %84, %85 : vector<4x8x16xi32>
    %87 = arith.extui %86 : vector<4x8x16xi1> to vector<4x8x16xi32>
    %88 = arith.sitofp %87 : vector<4x8x16xi32> to vector<4x8x16xf32>
    %89 = vector.broadcast %29 : vector<4x8x1xf32> to vector<4x8x16xf32>
    %90 = arith.mulf %88, %89 : vector<4x8x16xf32>
    %91 = arith.addf %82, %90 : vector<4x8x16xf32>
    "tpu.trace_start"() <{level = 10 : i32, message = "bpe,bea->bpa"}> : () -> ()
    %cst_14 = arith.constant dense<0.000000e+00> : vector<4x8x128xf32>
    %92 = tpu.matmul %91, %75, %cst_14 {dimension_numbers = #tpu.dot_dimension_numbers<[2], [1], [1], [2], [0, 0, 0, 1, 1, 2], [0], [0]>, precision = #tpu.contract_precision<fp32>} : vector<4x8x16xf32>, vector<4x16x128xf32>, vector<4x8x128xf32> -> vector<4x8x128xf32>
    "tpu.trace_stop"() : () -> ()
    %93 = arith.addf %70, %92 : vector<4x8x128xf32>
    %c0_15 = arith.constant 0 : index
    %c0_16 = arith.constant 0 : index
    %c0_17 = arith.constant 0 : index
    %94 = vector.load %arg6[%c0_15, %c0_16, %c0_17] : memref<4x8x128xf32, #tpu.memory_space<vmem>>, vector<4x8x128xf32>
    tpu.vector_store %arg6[%c0_15, %c0_16, %c0_17], %93 {strides = array<i32>} : memref<4x8x128xf32, #tpu.memory_space<vmem>>, vector<4x8x128xf32>,
    return
  }
  func.func @transform_0(%arg0: i32) -> (i32, i32, i32) {
    %c0_i32 = arith.constant 0 : i32
    %c0_i32_0 = arith.constant 0 : i32
    %c0_i32_1 = arith.constant 0 : i32
    return %arg0, %c0_i32, %c0_i32_0 : i32, i32, i32
  }
  func.func @transform_1(%arg0: i32) -> (i32, i32, i32) {
    %c0_i32 = arith.constant 0 : i32
    %c0_i32_0 = arith.constant 0 : i32
    %c0_i32_1 = arith.constant 0 : i32
    return %arg0, %c0_i32, %c0_i32_0 : i32, i32, i32
  }
  func.func @transform_2(%arg0: i32) -> (i32, i32, i32) {
    %c0_i32 = arith.constant 0 : i32
    %c0_i32_0 = arith.constant 0 : i32
    %c0_i32_1 = arith.constant 0 : i32
    return %arg0, %c0_i32, %c0_i32_0 : i32, i32, i32
  }
  func.func @transform_3(%arg0: i32) -> (i32, i32) {
    %c0_i32 = arith.constant 0 : i32
    %c0_i32_0 = arith.constant 0 : i32
    %c0_i32_1 = arith.constant 0 : i32
    return %c0_i32, %c0_i32_0 : i32, i32
  }
  func.func @transform_4(%arg0: i32) -> (i32, i32) {
    %c0_i32 = arith.constant 0 : i32
    %c0_i32_0 = arith.constant 0 : i32
    %c0_i32_1 = arith.constant 0 : i32
    return %c0_i32, %c0_i32_0 : i32, i32
  }
  func.func @transform_5(%arg0: i32) -> (i32, i32, i32) {
    %c0_i32 = arith.constant 0 : i32
    %c0_i32_0 = arith.constant 0 : i32
    %c0_i32_1 = arith.constant 0 : i32
    return %arg0, %c0_i32, %c0_i32_0 : i32, i32, i32
  }
}

</mosaic_0001>

<bundles_post_ra>
// kernel: tpu_custom_call.1
= control target key start
LH: loop header
LB: loop body
LE: loop exit
PB: predicated region body
PF: predicated region fallthrough
CT: control target
= control target key end

     0   :  { %10 = vsyncpa [#allocation3], 0  ;;  %s3106_s0 = inlined_call_operand.vmem [shape: s32[8,8,4], index: 0, kind: input, shape index: {}]   ;;  %s3107_s1 = inlined_call_operand.vmem [shape: f32[8,8,2], index: 1, kind: input, shape index: {}]   ;;  %s3108_s2 = inlined_call_operand.vmem [shape: f32[8,16,40], index: 2, kind: input, shape index: {}]   ;;  %s3109_s3 = inlined_call_operand.vmem [shape: f32[32,128], index: 3, kind: input, shape index: {}]   ;;  %s3110_s4 = inlined_call_operand.hbm [shape: f32[40,128], index: 4, kind: input, shape index: {}]   ;;  %s3111_s5 = inlined_call_operand.hbm [shape: f32[8,8,128], index: 5, kind: output, shape index: {}]  }
   0x1   :  { %11 = vsyncpa [#allocation4], 0 }
   0x2   :  { %13 = vsyncpa [#allocation4 + $0x1], 0  ;;  %s2487_s18 = smov 0   ;;  %s2489_s19 = smov 0  }
   0x3   :  { %s2491_s20 = smov 0   ;;  %s2493_s21 = smov 0  }
   0x4 LB: > { %s2508_s22 = sadd.s32 4294967295, %s2444_s21   ;;  %s2170_s23 = sadd.s32 4294967294, %s2444_s21   ;;  %s2444_s21 = sphi %s2493_s21, %s3117_s21   ;;  %s2440_s20 = sphi %s2491_s20, %s3116_s20   ;;  %s2436_s19 = sphi %s2489_s19, %s3115_s19   ;;  %s2432_s18 = sphi %s2487_s18, %s3114_s18  }
   0x5   : > { %s2512_s24 = sadd.s32 1, %s2444_s21   ;;  %s146_s25 = sadd.s32 1, %s2440_s20 }
   0x6   : > { %s143_s26 = ssub.s32 %s2444_s21, %s2512_s24  ;;  %p156_p0 = scmp.ne.s32.totalorder %s2440_s20, %s2436_s19 }
   0x7   : > { %p144_p1 = scmp.eq.s32.totalorder %s143_s26, 0  ;;  %p157_p2 = scmp.eq.s32.totalorder %s2508_s22, 1 }
   0x8   : > { %p162_p3 = scmp.ne.s32.totalorder %s2436_s19, %s2432_s18  ;;  %p163_p4 = scmp.eq.s32.totalorder %s2170_s23, 1 }
   0x9   : > { %s2523_s27 = scalar_select %p144_p1, %s2440_s20, %s146_s25  }
   0xa   : > { %p2525_p5 = por %p157_p2, %p156_p0  ;;  %p2529_p6 = por %p163_p4, %p162_p3 }
   0xb   : > { %p2171_p7 = scmp.ge.s32.totalorder %s2444_s21, 1  ;;  %p170_p8 = scmp.lt.s32.totalorder %s2444_s21, 3 }
   0xc   : > { %p2242_p9 = scmp.eq.s32.totalorder %s2508_s22, 0  ;;  %s184_s7 = sshll.u32 %s3110_s4, 4  ;;  %s185_s7 = int_to_ptr.hbm [resolvable:$true] %s184_s7 }
   0xd   : > { %p171_p10 = pnand %p2171_p7, %p170_p8  ;;  %s2446_s8 = smov [#allocation2]  }
   0xe   : > { %s186_s9 = sshll.u32 %s2446_s8, 4  ;;  %s2447_s10 = smov 128   ;;  %s187_s9 = int_to_ptr.vmem [resolvable:$true] %s186_s9 }
   0xf   : > { %p2234_p11 = pneg %p171_p10  ;;  %s2448_s11 = smov 8  }
  0x10   : > { %230 = sbr.rel (%p171_p10) target bundleno = 730 (0x2da), region = 40 }
  0x11   : > { %p2235_p12 = pnand %p2242_p9, %p2234_p11 }
  0x13   : > { %2237 = dma.hbm_to_vmem [thread:$0]  (!%p2235_p12), %s185_s7, 640, %s187_s9, [#allocation3], %s2447_s10, %s2447_s10, %s2448_s11  }
  0x15   : > { %2423 = dma.done.wait (%p2242_p9), [#allocation3], 640  }
  0x16   : > { %2425 = vsyncadd (%p2242_p9), [#allocation3], 4294966656  ;;  %s2177_s12 = sshll.u32 %s2508_s22, 2  ;;  %v2449_v0 = vmov 1   ;;  %v2450_v1 = vmov 0   ;;  %v2451_v6 = vmov 0.0  }
  0x17   : > { %p271_p13 = scmp.lt.s32.totalorder %s2177_s12, 7  ;;  %2293 = vset.pattern.permute.xlu1 %v2449_v0  ;;  %2301 = vset.pattern.permute.xlu2 %v2450_v1  ;;  %s2452_s17 = smov 1   ;;  %v2453_v28 = vmov 2   ;;  %v2454_v39 = vmov 3   ;;  %v553_v57 = vld [vmem:[%s3109_s3 + $0x18] sm:$0xff]  ;;  %v552_v59 = vld [vmem:[%s3109_s3 + $0x10] sm:$0xff] }
  0x18   : > { %2314 = vset.pattern.permute.xlu0 %v2450_v1  ;;  %v579_v58 = vand.u32 4294901760, %v553_v57  ;;  %v581_v61 = vand.u32 4294901760, %v552_v59  ;;  %v551_v62 = vld [vmem:[%s3109_s3 + $0x8] sm:$0xff] }
  0x19   : > { %s3119_s12 = smov (!%p271_p13, %s2177_s12), 7 }
  0x1a   : > { %s2178_s13 = sshll.u32 %s3119_s12, 3  ;;  %v633_v60 = vsub.f32 %v553_v57, %v579_v58  ;;  %731 = vmatpush.msra.mxu3 %v579_v58  ;;  %580 = vmatpush.msra.mxu0 %v579_v58  ;;  %s2226_s14 = sshll.u32 %s3119_s12, 4 }
  0x1b   : > { %s274_s16 = scalar_lea.vmem %s3106_s0, %s2178_s13  ;;  %s2598_s26 = scalar_lea.vmem %s3107_s1, %s2178_s13 }
  0x1c   : > { %v2557_v2 = vld [vmem:[%s274_s16] sm:$0xff]  ;;  %v2559_v3 = vld [vmem:[%s274_s16 + $0x8] sm:$0xff]  ;;  %v2561_v4 = vld [vmem:[%s274_s16 + $0x10] sm:$0xff]  ;;  %v634_v63 = vand.u32 4294901760, %v633_v60  ;;  %687 = vmatpush.msra.mxu2 %v633_v60  ;;  %733 = vmatpush.msra.mxu3 %v581_v61  ;;  %s2398_s12 = scalar_lea.hbm %s3111_s5, 64 }
  0x1d   : > { %vm298_vm0 = vcmp.eq.s32.totalorder %v2557_v2, 4  ;;  %vm299_vm1 = vcmp.eq.s32.totalorder %v2559_v3, 4  ;;  %vm318_vm2 = vcmp.eq.s32.totalorder %v2557_v2, 6  ;;  %vm319_vm3 = vcmp.eq.s32.totalorder %v2559_v3, 6  ;;  %v2567_v5 = vld [vmem:[%s274_s16 + $0x18] sm:$0xff]  ;;  %386 = vperm.xlu1 %2293, %v2557_v2   ;;  %v294_v15 = vld [vmem:[%s2598_s26] sm:$0xff]  ;;  %582 = vmatpush.msra.mxu0 %v581_v61  ;;  %s2806_s16 = scalar_lea.vmem %s3108_s2, %s2226_s14 }
  0x1e   : > { %vm322_vm4 = vmor %vm298_vm0, %vm318_vm2  ;;  %vm300_vm5 = vcmp.eq.s32.totalorder %v2561_v4, 4  ;;  %vm301_vm6 = vcmp.eq.s32.totalorder %v2567_v5, 4  ;;  %vm320_vm7 = vcmp.eq.s32.totalorder %v2561_v4, 6  ;;  %vm321_vm8 = vcmp.eq.s32.totalorder %v2567_v5, 6  ;;  %v295_v21 = vld [vmem:[%s2598_s26 + $0x8] sm:$0xff]  ;;  %v296_v23 = vld [vmem:[%s2598_s26 + $0x10] sm:$0xff] }
  0x1f   : > { %vm323_vm9 = vmor %vm299_vm1, %vm319_vm3  ;;  %v2188_v7 = vsel %vm322_vm4, 1.0, %v2451_v6  ;;  %vm302_vm11 = vcmp.eq.s32.totalorder %v2557_v2, 5  ;;  %vm304_vm14 = vcmp.eq.s32.totalorder %v2561_v4, 5  ;;  %v297_v25 = vld [vmem:[%s2598_s26 + $0x18] sm:$0xff]  ;;  %vm334_vm4 = vcmp.eq.s32.totalorder %v2557_v2, 3  ;;  %s2227_s26 = sshll.u32 %s2508_s22, 5 }
  0x20   : > { %v2189_v8 = vsel %vm323_vm9, 1.0, %v2451_v6  ;;  %vm324_vm10 = vmor %vm300_vm5, %vm320_vm7  ;;  %v440_v16 = vmul.f32 %v2188_v7, %v294_v15  ;;  %v2192_v40 = vsel %vm334_vm4, 1.0, %v2451_v6  ;;  %vm347_vm7 = vcmp.eq.s32.totalorder %v2559_v3, 2  ;;  %s2068_s7 = scalar_lea.hbm %s3111_s5, %s2227_s26 }
  0x21   : > { %v2288_v9 = vpack.i.bf16 %v2189_v8, %v2188_v7  ;;  %vm325_vm12 = vmor %vm301_vm6, %vm321_vm8  ;;  %v2190_v10 = vsel %vm324_vm10, 1.0, %v2451_v6  ;;  %v441_v22 = vmul.f32 %v2189_v8, %v295_v21  ;;  %v2197_v44 = vsel %vm347_vm7, 1.0, %v2451_v6  ;;  %s2071_s9 = sshll.u32 %s2068_s7, 4  ;;  %s2072_s9 = int_to_ptr.hbm [resolvable:$true] %s2071_s9 }
  0x22   : > { %vm306_vm13 = vmor %vm298_vm0, %vm302_vm11  ;;  %v2589_v11 = vsel %vm325_vm12, 1.0, %v2451_v6  ;;  %vm303_vm0 = vcmp.eq.s32.totalorder %v2559_v3, 5  ;;  %v442_v24 = vmul.f32 %v2190_v10, %v296_v23  ;;  %vm336_vm8 = vcmp.eq.s32.totalorder %v2561_v4, 3  ;;  %s2392_s10 = sshra.s32 %s2072_s9, 4  ;;  %s2393_s10 = int_to_ptr.hbm [resolvable:$true] %s2392_s10 }
  0x23   : > { %2289 = vrot.lane.b32.xlu0 %v2288_v9, %s2452_s17  ;;  %v2184_v12 = vsel %vm306_vm13, 1.0, %v2451_v6  ;;  %v2296_v14 = vpack.i.bf16 %v2589_v11, %v2190_v10  ;;  %vm308_vm15 = vmor %vm300_vm5, %vm304_vm14  ;;  %v443_v26 = vmul.f32 %v2589_v11, %v297_v25  ;;  %vm346_vm5 = vcmp.eq.s32.totalorder %v2557_v2, 2  ;;  %s2394_s11 = scalar_lea.hbm %s2393_s10, 32  ;;  %p2399_p3 = scmp.lt.s32.totalorder %s2393_s10, %s3111_s5 }
  0x24   : > { %v2302_v13 = vpack.i.bf16 %v2188_v7, %v2184_v12  ;;  %v2186_v17 = vsel %vm308_vm15, 1.0, %v2451_v6  ;;  %vm307_vm2 = vmor %vm299_vm1, %vm303_vm0  ;;  %vm305_vm1 = vcmp.eq.s32.totalorder %v2567_v5, 5  ;;  %v2196_v41 = vsel %vm346_vm5, 1.0, %v2451_v6  ;;  %p2395_p0 = scmp.ne.s32.totalorder %s2393_s10, %s2394_s11  ;;  %p2400_p4 = scmp.lt.s32.totalorder %s2398_s12, %s2394_s11 }
  0x25   : > { %2294 = vset.pattern.permute.xlu1 %v2450_v1  ;;  %v2315_v18 = vpack.i.bf16 %v2190_v10, %v2186_v17  ;;  %v2185_v19 = vsel %vm307_vm2, 1.0, %v2451_v6  ;;  %vm309_vm3 = vmor %vm301_vm6, %vm305_vm1  ;;  %v2328_v42 = vpack.i.bf16 %v2196_v41, %v2192_v40  ;;  %vm335_vm6 = vcmp.eq.s32.totalorder %v2559_v3, 3 }
  0x26   : > { %361 = vperm.xlu1 %2294, %v2557_v2   ;;  %2303 = vperm.xlu2 %2301, %v2302_v13   ;;  %v2308_v20 = vpack.i.bf16 %v2189_v8, %v2185_v19  ;;  %v2187_v38 = vsel %vm309_vm3, 1.0, %v2451_v6  ;;  %v2193_v43 = vsel %vm335_vm6, 1.0, %v2451_v6  ;;  %vm348_vm9 = vcmp.eq.s32.totalorder %v2561_v4, 2  ;;  %p2396_p1 = pnand %p2395_p0, %p2525_p5  ;;  %p2401_p7 = por %p2400_p4, %p2399_p3 }
  0x27   : > { %v2333_v45 = vpack.i.bf16 %v2197_v44, %v2193_v43  ;;  %v2194_v46 = vsel %vm336_vm8, 1.0, %v2451_v6  ;;  %v2198_v47 = vsel %vm348_vm9, 1.0, %v2451_v6  ;;  %vm337_vm10 = vcmp.eq.s32.totalorder %v2567_v5, 3  ;;  %v856_v44 = vld [vmem:[#allocation2 + $0x18] sm:$0xff] }
  0x28   : > { %v2338_v48 = vpack.i.bf16 %v2198_v47, %v2194_v46  ;;  %vm349_vm11 = vcmp.eq.s32.totalorder %v2567_v5, 2  ;;  %v2195_v49 = vsel %vm337_vm10, 1.0, %v2451_v6  ;;  %v358_v19 = vlaneseq  ;;  %p2397_p2 = pneg %p2396_p1 }
  0x29   : > { %v2199_v50 = vsel %vm349_vm11, 1.0, %v2451_v6  ;;  %v2724_v47 = vand.u32 4294901760, %v856_v44  ;;  %vm554_vm5 = vcmask 261120   ;;  %vm858_vm8 = vcmask 326656  }
  0x2a   : > { %v2343_v51 = vpack.i.bf16 %v2199_v50, %v2195_v49  ;;  %vm1399_vm11 = vcmask 130048   ;;  %p2402_p8 = pnand %p2401_p7, %p2397_p2 }
  0x2b   : > { %2297 = vrot.lane.b32.xlu0 %v2296_v14, %s2452_s17  ;;  %s267_s17 = sand.u32 1, %s2436_s19  }
  0x2c   : > { %s2176_s23 = sshll.u32 %s267_s17, 5  ;;  %s2057_s22 = scalar_lea.sflag [#allocation4], %s267_s17 }
  0x2d   : > { %s3063_s25 = scalar_lea.vmem [#allocation5], %s2176_s23 }
  0x2e   : > { %2295 = vset.pattern.permute.xlu1 %v2449_v0  ;;  %446 = vperm.xlu2 %2301, %v440_v16   ;;  %s2069_s8 = sshll.u32 %s3063_s25, 4  ;;  %s2070_s8 = int_to_ptr.vmem [resolvable:$true] %s2069_s8 }
  0x2f   : > { %389 = vperm.xlu1 %2295, %v2559_v3  }
  0x33   : > { %2316 = vperm.xlu0 %2314, %v2315_v18  }
  0x36   : > { %364 = vperm.xlu2 %2301, %v2559_v3  }
  0x37   : > { %2307 = vset.pattern.permute.xlu1 %v2450_v1 }
  0x38   : > { %2309 = vperm.xlu1 %2307, %v2308_v20  }
  0x3b   : > { %2322 = vset.pattern.permute.xlu0 %v2449_v0 }
  0x3e   : > { %451 = vperm.xlu2 %2301, %v441_v22   ;;  %v2687_v22 = vand.u32 127, %v358_v19 }
  0x40   : > { %2313 = vset.pattern.permute.xlu1 %v2449_v0  ;;  %vm437_vm14 = vcmp.eq.s32.totalorder %v2687_v22, 23  ;;  %vm523_vm2 = vcmp.eq.s32.totalorder %v2687_v22, 25  ;;  %vm472_vm3 = vcmp.eq.s32.totalorder %v2687_v22, 24 }
  0x41   : > { %392 = vperm.xlu1 %2313, %v2561_v4  }
  0x46   : > { %367 = vperm.xlu2 %2301, %v2561_v4  }
  0x49   : > { %2320 = vset.pattern.permute.xlu1 %v2450_v1 }
  0x4a   : > { %456 = vperm.xlu1 %2320, %v442_v24   ;;  %v2690_v24 = vadd.s32 4294967289, %v2687_v22 }
  0x4e   : > { %370 = vperm.xlu2 %2301, %v2567_v5  }
  0x52   : > { %2321 = vset.pattern.permute.xlu1 %v2449_v0 }
  0x53   : > { %395 = vperm.xlu1 %2321, %v2567_v5  }
  0x56   : > { %2325 = vset.pattern.permute.xlu2 %v2449_v0  ;;  %v639_v0 = vsub.f32 %v552_v59, %v581_v61 }
  0x58   : > { %690 = vmatpush.msra.mxu2 %v639_v0 }
  0x5b   : > { %2324 = vset.pattern.permute.xlu1 %v2450_v1 }
  0x5c   : > { %461 = vperm.xlu1 %2324, %v443_v26  }
  0x64   : > { %2326 = vset.pattern.permute.xlu1 %v2453_v28 }
  0x65   : > { %1299 = vperm.xlu1 %2326, %v2557_v2  }
  0x6d   : > { %1302 = vperm.xlu1 %2326, %v2559_v3  }
  0x75   : > { %1305 = vperm.xlu1 %2326, %v2561_v4  }
  0x7d   : > { %1308 = vperm.xlu1 %2326, %v2567_v5  }
  0x80   : > { %v2659_v52 = vpop.permute.xlu2 %2303 }
  0x88   : > { %v2663_v54 = vpop.permute.xlu2 %446 }
  0x8f   : > { %v2661_v53 = vpop.permute.xlu1 %386 }
  0x90   : > { %v2667_v56 = vpop.permute.xlu2 %364  ;;  %vm397_vm12 = vcmp.eq.s32.totalorder %v2690_v24, %v2661_v53  ;;  %v855_v53 = vld [vmem:[#allocation2 + $0x10] sm:$0xff] }
  0x91   : > { %v2205_v28 = vsel %vm397_vm12, 1.0, %v2451_v6  ;;  %vm373_vm4 = vcmp.eq.s32.totalorder %v2687_v22, %v2667_v56  ;;  %v2739_v57 = vand.u32 4294901760, %v855_v53 }
  0x95   : > { %v2290_v27 = vpop.permute.xlu0 %2289 }
  0x96   : > { %v2291_v29 = vunpack.i.l.bf16 %v2290_v27  ;;  %v2292_v31 = vunpack.i.h.bf16 %v2290_v27  ;;  %v2305_v27 = vunpack.i.l.bf16 %v2659_v52 }
  0x98   : > { %v491_v30 = vmul.f32 %v2291_v29, %v294_v15  ;;  %v492_v34 = vmul.f32 %v2292_v31, %v295_v21  ;;  %v2665_v55 = vpop.permute.xlu1 %361  ;;  %v2683_v13 = vpop.permute.xlu2 %451 }
  0x99   : > { %vm372_vm15 = vcmp.eq.s32.totalorder %v2687_v22, %v2665_v55 }
  0x9a   : > { %497 = vperm.xlu0 %2322, %v491_v30  }
  0x9d   : > { %v2298_v32 = vpop.permute.xlu0 %2297 }
  0x9e   : > { %v2299_v33 = vunpack.i.l.bf16 %v2298_v32  ;;  %v2300_v36 = vunpack.i.h.bf16 %v2298_v32  ;;  %v429_v32 = vmul.f32 %v2305_v27, %v2205_v28 }
  0xa0   : > { %v493_v35 = vmul.f32 %v2299_v33, %v296_v23  ;;  %v494_v37 = vmul.f32 %v2300_v36, %v297_v25  ;;  %v368_v23 = vpop.permute.xlu2 %367  ;;  %v2705_v33 = vsel %vm437_vm14, 1.0, %v2451_v6  ;;  %v857_v36 = vld [vmem:[#allocation2 + $0x20] sm:$0xff] }
  0xa1   : > { %vm374_vm0 = vcmp.eq.s32.totalorder %v2687_v22, %v368_v23  ;;  %v464_v40 = vmul.f32 %v2705_v33, %v2663_v54 }
  0xa2   : > { %502 = vperm.xlu0 %2322, %v492_v34   ;;  %507 = vperm.xlu2 %2325, %v493_v35   ;;  %v2200_v34 = vsel %vm372_vm15, 1.0, %v2451_v6 }
  0xa3   : > { %v433_v41 = vadd.f32 %v2200_v34, %v429_v32 }
  0xa5   : > { %v2317_v26 = vpop.permute.xlu0 %2316 }
  0xa6   : > { %v2318_v29 = vunpack.i.l.bf16 %v2317_v26  ;;  %v2319_v49 = vunpack.i.h.bf16 %v2317_v26 }
  0xa8   : > { %v2700_v30 = vpop.permute.xlu2 %370 }
  0xa9   : > { %vm375_vm7 = vcmp.eq.s32.totalorder %v2687_v22, %v2700_v30 }
  0xaa   : > { %2323 = vset.pattern.permute.xlu0 %v2450_v1  ;;  %512 = vperm.xlu2 %2325, %v494_v37   ;;  %v583_v1 = vand.u32 4294901760, %v551_v62  ;;  %v2202_v37 = vsel %vm374_vm0, 1.0, %v2451_v6 }
  0xab   : > { %426 = vperm.xlu0 %2323, %v2187_v38   ;;  %v2713_v38 = vand.u32 4294901760, %v857_v36 }
  0xac   : > { %v645_v7 = vsub.f32 %v551_v62, %v583_v1  ;;  %735 = vmatpush.msra.mxu3 %v583_v1  ;;  %584 = vmatpush.msra.mxu0 %v583_v1  ;;  %v468_v62 = vadd.f32 %v464_v40, %v433_v41 }
  0xae   : > { %693 = vmatpush.msra.mxu2 %v645_v7 }
  0xb2   : > { %2327 = vset.pattern.permute.xlu2 %v2454_v39  ;;  %v2306_v39 = vunpack.i.h.bf16 %v2659_v52 }
  0xb3   : > { %539 = vperm.xlu0 %2323, %v2589_v11   ;;  %1348 = vperm.xlu2 %2327, %v2557_v2   ;;  %v2678_v2 = vpop.permute.xlu1 %389  ;;  %v646_v11 = vand.u32 4294901760, %v645_v7 }
  0xb4   : > { %vm398_vm1 = vcmp.eq.s32.totalorder %v2690_v24, %v2678_v2 }
  0xb5   : > { %v647_v15 = vsub.f32 %v645_v7, %v646_v11  ;;  %v2206_v46 = vsel %vm398_vm1, 1.0, %v2451_v6 }
  0xb7   : > { %v648_v17 = vand.u32 4294901760, %v647_v15  ;;  %v465_v15 = vmul.f32 %v2705_v33, %v2683_v13 }
  0xbb   : > { %2329 = vperm.xlu0 %2323, %v2328_v42   ;;  %1351 = vperm.xlu2 %2327, %v2559_v3   ;;  %v550_v3 = vld [vmem:[%s3109_s3] sm:$0xff]  ;;  %v2685_v21 = vpop.permute.xlu1 %2309 }
  0xbc   : > { %v585_v8 = vand.u32 4294901760, %v550_v3  ;;  %v2311_v42 = vunpack.i.l.bf16 %v2685_v21  ;;  %v2312_v28 = vunpack.i.h.bf16 %v2685_v21 }
  0xbe   : > { %v651_v12 = vsub.f32 %v550_v3, %v585_v8  ;;  %737 = vmatpush.msra.mxu3 %v585_v8  ;;  %586 = vmatpush.msra.mxu0 %v585_v8 }
  0xc0   : > { %v652_v16 = vand.u32 4294901760, %v651_v12  ;;  %696 = vmatpush.msra.mxu2 %v651_v12  ;;  %778 = vmatpush.msrb.mxu0 %v634_v63 }
  0xc2   : > { %v653_v18 = vsub.f32 %v651_v12, %v652_v16  ;;  %895 = vmatpush.msrb.mxu2 %v2713_v38 }
  0xc3   : > { %2334 = vperm.xlu0 %2323, %v2333_v45   ;;  %1354 = vperm.xlu2 %2327, %v2561_v4   ;;  %v635_v4 = vsub.f32 %v633_v60, %v634_v63  ;;  %v393_v25 = vpop.permute.xlu1 %392  ;;  %v2720_v45 = vsel %vm523_vm2, 1.0, %v2451_v6  ;;  %v430_v60 = vmul.f32 %v2311_v42, %v2206_v46  ;;  %v854_v63 = vld [vmem:[#allocation2 + $0x8] sm:$0xff] }
  0xc4   : > { %v654_v20 = vand.u32 4294901760, %v653_v18  ;;  %vm399_vm13 = vcmp.eq.s32.totalorder %v2690_v24, %v393_v25  ;;  %897 = vmatpush.msrb.mxu2 %v2724_v47  ;;  %v542_v59 = vmul.f32 %v2306_v39, %v2720_v45  ;;  %v2757_v7 = vand.u32 4294901760, %v854_v63 }
  0xc5   : > { %v636_v9 = vand.u32 4294901760, %v635_v4  ;;  %v2207_v31 = vsel %vm399_vm13, 1.0, %v2451_v6  ;;  %v2201_v4 = vsel %vm373_vm4, 1.0, %v2451_v6  ;;  %v543_v42 = vmul.f32 %v2312_v28, %v2720_v45 }
  0xc6   : > { %v431_v35 = vmul.f32 %v2318_v29, %v2207_v31  ;;  %899 = vmatpush.msrb.mxu2 %v2739_v57  ;;  %v434_v18 = vadd.f32 %v2201_v4, %v430_v60 }
  0xc7   : > { %637 = vmatpush.msra.mxu1 %v636_v9  ;;  %v853_v9 = vld [vmem:[#allocation2] sm:$0xff] }
  0xc8   : > { %v435_v50 = vadd.f32 %v2202_v37, %v431_v35  ;;  %901 = vmatpush.msrb.mxu2 %v2757_v7  ;;  %v469_v39 = vadd.f32 %v465_v15, %v434_v18  ;;  %v846_v15 = vld [vmem:[%s2806_s16 + $0x8] sm:$0xff] }
  0xcb   : > { %2339 = vperm.xlu0 %2323, %v2338_v48   ;;  %1357 = vperm.xlu2 %2327, %v2567_v5   ;;  %v640_v5 = vand.u32 4294901760, %v639_v0  ;;  %v457_v43 = vpop.permute.xlu1 %456  ;;  %v2727_v48 = vsub.f32 %v857_v36, %v2713_v38 }
  0xcc   : > { %v466_v54 = vmul.f32 %v2705_v33, %v457_v43 }
  0xcd   : > { %v641_v10 = vsub.f32 %v639_v0, %v640_v5  ;;  %782 = vmatpush.msrb.mxu0 %v640_v5  ;;  %v982_v55 = vand.u32 4294901760, %v2727_v48  ;;  %v544_v5 = vmul.f32 %v2319_v49, %v2720_v45 }
  0xcf   : > { %v642_v14 = vand.u32 4294901760, %v641_v10  ;;  %786 = vmatpush.msrb.mxu0 %v646_v11  ;;  %v983_v2 = vsub.f32 %v2727_v48, %v982_v55  ;;  %v470_v10 = vadd.f32 %v466_v54, %v435_v50 }
  0xd1   : > { %643 = vmatpush.msra.mxu1 %v642_v14  ;;  %790 = vmatpush.msrb.mxu0 %v652_v16  ;;  %v984_v12 = vand.u32 4294901760, %v983_v2  ;;  %v2767_v16 = vand.u32 4294901760, %v853_v9  ;;  %v845_v2 = vld [vmem:[%s2806_s16] sm:$0xff] }
  0xd3   : > { %2344 = vperm.xlu0 %2323, %v2343_v51   ;;  %649 = vmatpush.msra.mxu1 %v648_v17  ;;  %v2734_v51 = vsel %vm472_vm3, 1.0, %v2451_v6  ;;  %v2770_v17 = vsub.f32 %v854_v63, %v2757_v7  ;;  %v396_v23 = vpop.permute.xlu1 %395  ;;  %v2778_v27 = vsub.f32 %v853_v9, %v2767_v16  ;;  %v860_v9 = vsel %vm858_vm8, %v845_v2, 0 }
  0xd4   : > { %985 = vmatpush.msrb.mxu3 %v984_v12  ;;  %903 = vmatpush.msrb.mxu2 %v2767_v16  ;;  %vm400_vm6 = vcmp.eq.s32.totalorder %v2690_v24, %v396_v23  ;;  %v2838_v12 = vand.u32 4294901760, %v860_v9 }
  0xd5   : > { %655 = vmatpush.msra.mxu1 %v654_v20  ;;  %v1000_v26 = vand.u32 4294901760, %v2770_v17  ;;  %v1006_v36 = vand.u32 4294901760, %v2778_v27 }
  0xd7   : > { %821 = vmatpush.msrb.mxu1 %v579_v58  ;;  %v2742_v58 = vsub.f32 %v856_v44, %v2724_v47  ;;  %v1001_v35 = vsub.f32 %v2770_v17, %v1000_v26  ;;  %v1007_v46 = vsub.f32 %v2778_v27, %v1006_v36 }
  0xd9   : > { %823 = vmatpush.msrb.mxu1 %v581_v61  ;;  %v988_v3 = vand.u32 4294901760, %v2742_v58  ;;  %v1002_v41 = vand.u32 4294901760, %v1001_v35 }
  0xdb   : > { %825 = vmatpush.msrb.mxu1 %v583_v1  ;;  %v989_v14 = vsub.f32 %v2742_v58, %v988_v3 }
  0xdd   : > { %827 = vmatpush.msrb.mxu1 %v585_v8  ;;  %v2760_v8 = vsub.f32 %v855_v53, %v2739_v57  ;;  %v990_v25 = vand.u32 4294901760, %v989_v14  ;;  %v1008_v53 = vand.u32 4294901760, %v1007_v46 }
  0xdf   : > { %v994_v56 = vand.u32 4294901760, %v2760_v8  ;;  %991 = vmatpush.msrb.mxu3 %v990_v25  ;;  %v847_v25 = vld [vmem:[%s2806_s16 + $0x10] sm:$0xff] }
  0xe0   : > { %v866_v28 = vsel %vm858_vm8, %v847_v25, 0 }
  0xe1   : > { %v995_v13 = vsub.f32 %v2760_v8, %v994_v56  ;;  %v2865_v35 = vand.u32 4294901760, %v866_v28 }
  0xe3   : > { %v996_v34 = vand.u32 4294901760, %v995_v13 }
  0xe5   : > { %997 = vmatpush.msrb.mxu3 %v996_v34 }
  0xe7   : > { %1003 = vmatpush.msrb.mxu3 %v1002_v41 }
  0xe9   : > { %1009 = vmatpush.msrb.mxu3 %v1008_v53 }
  0xfc   : > { %v508_v52 = vpop.permute.xlu2 %507 }
  0xfd   : > { %v517_v0 = vmul.f32 %v2734_v51, %v508_v52 }
  0xff   : > { %v521_v19 = vadd.f32 %v517_v0, %v470_v10 }
 0x101   : > { %v548_v37 = vadd.f32 %v544_v5, %v521_v19 }
 0x103   : > { %v562_v49 = vsel %vm554_vm5, %v548_v37, 0 }
 0x104   : > { %v2813_v60 = vand.u32 4294901760, %v562_v49 }
 0x106   : > { %v604_v5 = vsub.f32 %v562_v49, %v2813_v60 }
 0x10c   : > { %v498_v61 = vpop.permute.xlu0 %497 }
 0x10d   : > { %v515_v1 = vmul.f32 %v2734_v51, %v498_v61  ;;  %v2208_v61 = vsel %vm400_vm6, 1.0, %v2451_v6 }
 0x10f   : > { %v519_v11 = vadd.f32 %v515_v1, %v468_v62 }
 0x111   : > { %v546_v20 = vadd.f32 %v542_v59, %v519_v11  ;;  %v462_v59 = vpop.permute.xlu1 %461  ;;  %v605_v11 = vand.u32 4294901760, %v604_v5 }
 0x112   : > { %v467_v0 = vmul.f32 %v2705_v33, %v462_v59  ;;  %v513_v33 = vpop.permute.xlu2 %512 }
 0x113   : > { %v556_v29 = vsel %vm554_vm5, %v546_v20, 0  ;;  %v518_v10 = vmul.f32 %v2734_v51, %v513_v33 }
 0x114   : > { %v503_v31 = vpop.permute.xlu0 %502  ;;  %v2782_v32 = vand.u32 4294901760, %v556_v29 }
 0x115   : > { %v516_v40 = vmul.f32 %v2734_v51, %v503_v31 }
 0x116   : > { %657 = vmatmul.f32.vlgmr.msra.gmra.mxu1 %v2782_v32  ;;  %v588_v21 = vsub.f32 %v556_v29, %v2782_v32 }
 0x117   : > { %v520_v43 = vadd.f32 %v516_v40, %v469_v39  ;;  %1122 = vmatpush.msra.mxu1 %v2713_v38  ;;  %v2871_v39 = vsub.f32 %v866_v28, %v2865_v35 }
 0x118   : > { %699 = vmatmul.f32.vlgmr.msra.gmra.mxu2 %v588_v21  ;;  %v589_v44 = vand.u32 4294901760, %v588_v21 }
 0x119   : > { %v547_v50 = vadd.f32 %v543_v42, %v520_v43  ;;  %1124 = vmatpush.msra.mxu1 %v2724_v47  ;;  %1194 = vmatpush.msra.mxu2 %v982_v55  ;;  %v922_v41 = vand.u32 4294901760, %v2871_v39  ;;  %v849_v43 = vld [vmem:[%s2806_s16 + $0x20] sm:$0xff] }
 0x11a   : > { %741 = vmatmul.f32.vlgmr.msra.gmra.mxu3 %v589_v44  ;;  %v590_v52 = vsub.f32 %v588_v21, %v589_v44  ;;  %v872_v49 = vsel %vm858_vm8, %v849_v43, 0 }
 0x11b   : > { %v559_v54 = vsel %vm554_vm5, %v547_v50, 0  ;;  %1126 = vmatpush.msra.mxu1 %v2739_v57  ;;  %1198 = vmatpush.msra.mxu2 %v988_v3  ;;  %v2203_v3 = vsel %vm375_vm7, 1.0, %v2451_v6  ;;  %v923_v44 = vsub.f32 %v2871_v39, %v922_v41  ;;  %v2885_v53 = vand.u32 4294901760, %v872_v49 }
 0x11c   : > { %v591_v55 = vand.u32 4294901760, %v590_v52  ;;  %v2811_v24 = vand.u32 4294901760, %v559_v54  ;;  %1256 = vmatpush.msra.mxu3 %v2713_v38 }
 0x11d   : > { %v427_v62 = vpop.permute.xlu0 %426  ;;  %1128 = vmatpush.msra.mxu1 %v2757_v7  ;;  %1202 = vmatpush.msra.mxu2 %v994_v56  ;;  %v2850_v56 = vsub.f32 %v860_v9, %v2838_v12  ;;  %v924_v50 = vand.u32 4294901760, %v923_v44  ;;  %v937_v59 = vsub.f32 %v872_v49, %v2885_v53 }
 0x11e   : > { %v432_v63 = vmul.f32 %v2208_v61, %v427_v62  ;;  %592 = vmatmul.f32.vlgmr.msra.gmra.mxu0 %v591_v55  ;;  %661 = vmatmul.f32.gmra.mxu1 %v2811_v24  ;;  %v596_v1 = vsub.f32 %v559_v54, %v2811_v24 }
 0x11f   : > { %1056 = vmatpush.msra.mxu0 %v2727_v48  ;;  %1130 = vmatpush.msra.mxu1 %v2767_v16  ;;  %v906_v20 = vand.u32 4294901760, %v2850_v56  ;;  %v938_v62 = vand.u32 4294901760, %v937_v59 }
 0x120   : > { %v436_v38 = vadd.f32 %v2203_v3, %v432_v63  ;;  %704 = vmatmul.f32.gmra.mxu2 %v596_v1  ;;  %v597_v4 = vand.u32 4294901760, %v596_v1  ;;  %1258 = vmatpush.msra.mxu3 %v2724_v47 }
 0x121   : > { %1059 = vmatpush.msra.mxu0 %v2742_v58  ;;  %1206 = vmatpush.msra.mxu2 %v1000_v26  ;;  %v907_v26 = vsub.f32 %v2850_v56, %v906_v20 }
 0x122   : > { %v471_v30 = vadd.f32 %v467_v0, %v436_v38  ;;  %747 = vmatmul.f32.gmra.mxu3 %v597_v4  ;;  %v598_v48 = vsub.f32 %v596_v1, %v597_v4  ;;  %v939_v0 = vsub.f32 %v937_v59, %v938_v62 }
 0x123   : > { %1062 = vmatpush.msra.mxu0 %v2760_v8  ;;  %1260 = vmatpush.msra.mxu3 %v2739_v57  ;;  %v606_v57 = vsub.f32 %v604_v5, %v605_v11  ;;  %v908_v31 = vand.u32 4294901760, %v907_v26 }
 0x124   : > { %v599_v47 = vand.u32 4294901760, %v598_v48  ;;  %1210 = vmatpush.msra.mxu2 %v1006_v36  ;;  %v522_v14 = vadd.f32 %v518_v10, %v471_v30  ;;  %v848_v36 = vld [vmem:[%s2806_s16 + $0x18] sm:$0xff]  ;;  %v940_v3 = vand.u32 4294901760, %v939_v0 }
 0x125   : > { %v540_v58 = vpop.permute.xlu0 %539  ;;  %1065 = vmatpush.msra.mxu0 %v2770_v17  ;;  %1262 = vmatpush.msra.mxu3 %v2757_v7  ;;  %v863_v17 = vsel %vm858_vm8, %v846_v15, 0  ;;  %v607_v19 = vand.u32 4294901760, %v606_v57  ;;  %v869_v40 = vsel %vm858_vm8, %v848_v36, 0 }
 0x126   : > { %v545_v8 = vmul.f32 %v2720_v45, %v540_v58  ;;  %600 = vmatmul.f32.gmra.mxu0 %v599_v47  ;;  %665 = vmatmul.f32.gmra.mxu1 %v2813_v60  ;;  %v2856_v23 = vand.u32 4294901760, %v863_v17  ;;  %v2876_v42 = vand.u32 4294901760, %v869_v40 }
 0x127   : > { %1068 = vmatpush.msra.mxu0 %v2778_v27  ;;  %1264 = vmatpush.msra.mxu3 %v2767_v16 }
 0x128   : > { %v549_v51 = vadd.f32 %v545_v8, %v522_v14  ;;  %709 = vmatmul.f32.gmra.mxu2 %v604_v5  ;;  %v2861_v16 = vsub.f32 %v863_v17, %v2856_v23  ;;  %v929_v46 = vsub.f32 %v869_v40, %v2876_v42  ;;  %v852_v5 = vld [vmem:[%s2806_s16 + $0x38] sm:$0xff] }
 0x129   : > { %v881_v9 = vsel %vm858_vm8, %v852_v5, 0 }
 0x12a   : > { %v565_v45 = vsel %vm554_vm5, %v549_v51, 0  ;;  %753 = vmatmul.f32.gmra.mxu3 %v605_v11  ;;  %v914_v34 = vand.u32 4294901760, %v2861_v16  ;;  %v930_v52 = vand.u32 4294901760, %v929_v46  ;;  %v2906_v10 = vand.u32 4294901760, %v881_v9 }
 0x12b   : > { %v611_v18 = vand.u32 4294901760, %v565_v45 }
 0x12c   : > { %v915_v37 = vsub.f32 %v2861_v16, %v914_v34  ;;  %v931_v54 = vsub.f32 %v929_v46, %v930_v52  ;;  %v961_v11 = vsub.f32 %v881_v9, %v2906_v10 }
 0x12d   : > { %v612_v7 = vsub.f32 %v565_v45, %v611_v18 }
 0x12e   : > { %608 = vmatmul.f32.gmra.mxu0 %v607_v19  ;;  %669 = vmatmul.f32.gmra.mxu1 %v611_v18  ;;  %v916_v21 = vand.u32 4294901760, %v915_v37  ;;  %v932_v61 = vand.u32 4294901760, %v931_v54  ;;  %v962_v14 = vand.u32 4294901760, %v961_v11 }
 0x12f   : > { %v613_v13 = vand.u32 4294901760, %v612_v7 }
 0x130   : > { %714 = vmatmul.f32.gmra.mxu2 %v612_v7  ;;  %v963_v8 = vsub.f32 %v961_v11, %v962_v14 }
 0x131   : > { %v614_v27 = vsub.f32 %v612_v7, %v613_v13 }
 0x132   : > { %759 = vmatmul.f32.gmra.mxu3 %v613_v13  ;;  %v964_v15 = vand.u32 4294901760, %v963_v8  ;;  %v2952_v8 = vadd.s32 4294967288, %v2687_v22 }
 0x133   : > { %v615_v29 = vand.u32 4294901760, %v614_v27 }
 0x136   : > { %616 = vmatmul.f32.gmra.mxu0 %v615_v29  ;;  %829 = vmatmul.f32.vlgmr.msrb.gmra.mxu1 %v2782_v32 }
 0x138   : > { %909 = vmatmul.f32.vlgmr.msrb.gmra.mxu2 %v908_v31 }
 0x13a   : > { %1011 = vmatmul.f32.vlgmr.msrb.gmra.mxu3 %v2838_v12 }
 0x13e   : > { %792 = vmatmul.f32.vlgmr.msrb.gmra.mxu0 %v2782_v32  ;;  %833 = vmatmul.f32.gmra.mxu1 %v2811_v24  ;;  %v850_v32 = vld [vmem:[%s2806_s16 + $0x28] sm:$0xff] }
 0x13f   : > { %v875_v55 = vsel %vm858_vm8, %v850_v32, 0 }
 0x140   : > { %917 = vmatmul.f32.gmra.mxu2 %v916_v21  ;;  %v2893_v63 = vand.u32 4294901760, %v875_v55 }
 0x142   : > { %1015 = vmatmul.f32.gmra.mxu3 %v2856_v23  ;;  %v945_v1 = vsub.f32 %v875_v55, %v2893_v63 }
 0x144   : > { %v946_v38 = vand.u32 4294901760, %v945_v1 }
 0x146   : > { %796 = vmatmul.f32.gmra.mxu0 %v2811_v24  ;;  %837 = vmatmul.f32.gmra.mxu1 %v2813_v60  ;;  %v851_v24 = vld [vmem:[%s2806_s16 + $0x30] sm:$0xff]  ;;  %v947_v33 = vsub.f32 %v945_v1, %v946_v38 }
 0x147   : > { %v878_v2 = vsel %vm858_vm8, %v851_v24, 0 }
 0x148   : > { %925 = vmatmul.f32.gmra.mxu2 %v924_v50  ;;  %v2900_v4 = vand.u32 4294901760, %v878_v2  ;;  %v948_v30 = vand.u32 4294901760, %v947_v33 }
 0x14a   : > { %1019 = vmatmul.f32.gmra.mxu3 %v2865_v35 }
 0x14e   : > { %800 = vmatmul.f32.gmra.mxu0 %v2813_v60  ;;  %841 = vmatmul.f32.gmra.mxu1 %v611_v18  ;;  %v953_v60 = vsub.f32 %v878_v2, %v2900_v4 }
 0x150   : > { %933 = vmatmul.f32.gmra.mxu2 %v932_v61  ;;  %v954_v48 = vand.u32 4294901760, %v953_v60 }
 0x152   : > { %1023 = vmatmul.f32.gmra.mxu3 %v2876_v42  ;;  %v955_v47 = vsub.f32 %v953_v60, %v954_v48 }
 0x154   : > { %v956_v58 = vand.u32 4294901760, %v955_v47 }
 0x156   : > { %804 = vmatmul.f32.gmra.mxu0 %v611_v18  ;;  %1134 = vmatmul.f32.vlgmr.msra.gmra.mxu1 %v906_v20 }
 0x158   : > { %941 = vmatmul.f32.gmra.mxu2 %v940_v3 }
 0x15a   : > { %1027 = vmatmul.f32.gmra.mxu3 %v2885_v53 }
 0x15e   : > { %1071 = vmatmul.f32.vlgmr.msra.gmra.mxu0 %v2850_v56  ;;  %1140 = vmatmul.f32.gmra.mxu1 %v914_v34 }
 0x160   : > { %949 = vmatmul.f32.gmra.mxu2 %v948_v30 }
 0x162   : > { %1031 = vmatmul.f32.gmra.mxu3 %v2893_v63 }
 0x166   : > { %1076 = vmatmul.f32.gmra.mxu0 %v2861_v16  ;;  %1146 = vmatmul.f32.gmra.mxu1 %v922_v41 }
 0x168   : > { %957 = vmatmul.f32.gmra.mxu2 %v956_v58 }
 0x16a   : > { %1035 = vmatmul.f32.gmra.mxu3 %v2900_v4 }
 0x16e   : > { %1081 = vmatmul.f32.gmra.mxu0 %v2871_v39  ;;  %1152 = vmatmul.f32.gmra.mxu1 %v930_v52 }
 0x170   : > { %965 = vmatmul.f32.gmra.mxu2 %v964_v15  ;;  %v1300_v15 = vpop.permute.xlu1 %1299 }
 0x171   : > { %vm1310_vm9 = vcmp.eq.s32.totalorder %v2687_v22, %v1300_v15 }
 0x172   : > { %1039 = vmatmul.f32.gmra.mxu3 %v2906_v10 }
 0x176   : > { %1086 = vmatmul.f32.gmra.mxu0 %v929_v46  ;;  %1158 = vmatmul.f32.gmra.mxu1 %v938_v62 }
 0x178   : > { %1212 = vmatmul.f32.vlgmr.msra.gmra.mxu2 %v2838_v12 }
 0x17a   : > { %1266 = vmatmul.f32.vlgmr.msra.gmra.mxu3 %v2838_v12 }
 0x17e   : > { %1091 = vmatmul.f32.gmra.mxu0 %v937_v59  ;;  %1164 = vmatmul.f32.gmra.mxu1 %v946_v38 }
 0x180   : > { %1216 = vmatmul.f32.gmra.mxu2 %v2856_v23 }
 0x182   : > { %1270 = vmatmul.f32.gmra.mxu3 %v2856_v23 }
 0x186   : > { %1096 = vmatmul.f32.gmra.mxu0 %v945_v1  ;;  %1170 = vmatmul.f32.gmra.mxu1 %v954_v48 }
 0x188   : > { %1220 = vmatmul.f32.gmra.mxu2 %v2865_v35 }
 0x18a   : > { %1274 = vmatmul.f32.gmra.mxu3 %v2865_v35 }
 0x18e   : > { %1101 = vmatmul.f32.gmra.mxu0 %v953_v60  ;;  %1176 = vmatmul.f32.gmra.mxu1 %v962_v14 }
 0x190   : > { %1224 = vmatmul.f32.gmra.mxu2 %v2876_v42 }
 0x192   : > { %1278 = vmatmul.f32.gmra.mxu3 %v2876_v42 }
 0x193   : > { %v658_v51 = vpop.f32.mrf.mxu1 }
 0x196   : > { %1106 = vmatmul.f32.gmra.mxu0 %v961_v11 }
 0x198   : > { %1228 = vmatmul.f32.gmra.mxu2 %v2885_v53 }
 0x19a   : > { %1282 = vmatmul.f32.gmra.mxu3 %v2885_v53 }
 0x19b   : > { %v593_v12 = vpop.f32.mrf.mxu0  ;;  %v662_v57 = vpop.f32.mrf.mxu1 }
 0x19c   : > { %v659_v56 = vadd.f32 %v658_v51, %v593_v12  ;;  %v700_v17 = vpop.f32.mrf.mxu2  ;;  %v1349_v51 = vpop.permute.xlu2 %1348 }
 0x19d   : > { %v742_v45 = vpop.f32.mrf.mxu3  ;;  %v2330_v12 = vpop.permute.xlu0 %2329  ;;  %vm1359_vm10 = vcmp.eq.s32.totalorder %v2952_v8, %v1349_v51 }
 0x19e   : > { %v701_v18 = vadd.f32 %v700_v17, %v659_v56  ;;  %v2332_v17 = vunpack.i.h.bf16 %v2330_v12 }
 0x1a0   : > { %v743_v19 = vadd.f32 %v742_v45, %v701_v18  ;;  %1232 = vmatmul.f32.gmra.mxu2 %v2893_v63  ;;  %v2331_v45 = vunpack.i.l.bf16 %v2330_v12 }
 0x1a2   : > { %1286 = vmatmul.f32.gmra.mxu3 %v2893_v63 }
 0x1a3   : > { %v601_v20 = vpop.f32.mrf.mxu0  ;;  %v666_v23 = vpop.f32.mrf.mxu1 }
 0x1a4   : > { %v663_v7 = vadd.f32 %v662_v57, %v601_v20  ;;  %v705_v25 = vpop.f32.mrf.mxu2  ;;  %v2217_v20 = vsel %vm1359_vm10, 1.0, %v2451_v6 }
 0x1a5   : > { %v748_v13 = vpop.f32.mrf.mxu3 }
 0x1a6   : > { %v706_v26 = vadd.f32 %v705_v25, %v663_v7 }
 0x1a8   : > { %v749_v16 = vadd.f32 %v748_v13, %v706_v26  ;;  %1236 = vmatmul.f32.gmra.mxu2 %v2900_v4  ;;  %v1391_v13 = vmul.f32 %v2332_v17, %v2217_v20 }
 0x1aa   : > { %1290 = vmatmul.f32.gmra.mxu3 %v2900_v4 }
 0x1ab   : > { %v609_v27 = vpop.f32.mrf.mxu0  ;;  %v670_v31 = vpop.f32.mrf.mxu1 }
 0x1ac   : > { %v667_v28 = vadd.f32 %v666_v23, %v609_v27  ;;  %v710_v29 = vpop.f32.mrf.mxu2 }
 0x1ad   : > { %v754_v34 = vpop.f32.mrf.mxu3 }
 0x1ae   : > { %v711_v35 = vadd.f32 %v710_v29, %v667_v28 }
 0x1b0   : > { %v755_v36 = vadd.f32 %v754_v34, %v711_v35  ;;  %1240 = vmatmul.f32.gmra.mxu2 %v2906_v10 }
 0x1b2   : > { %1294 = vmatmul.f32.gmra.mxu3 %v2906_v10 }
 0x1b3   : > { %v617_v37 = vpop.f32.mrf.mxu0  ;;  %v830_v42 = vpop.f32.mrf.mxu1 }
 0x1b4   : > { %v671_v39 = vadd.f32 %v670_v31, %v617_v37  ;;  %v715_v40 = vpop.f32.mrf.mxu2 }
 0x1b5   : > { %v760_v21 = vpop.f32.mrf.mxu3 }
 0x1b6   : > { %v716_v41 = vadd.f32 %v715_v40, %v671_v39 }
 0x1b8   : > { %v761_v43 = vadd.f32 %v760_v21, %v716_v41 }
 0x1bb   : > { %v793_v44 = vpop.f32.mrf.mxu0  ;;  %v834_v32 = vpop.f32.mrf.mxu1 }
 0x1bc   : > { %v794_v46 = vadd.f32 %v793_v44, %v743_v19  ;;  %v910_v49 = vpop.f32.mrf.mxu2  ;;  %v2212_v19 = vsel %vm1310_vm9, 1.0, %v2451_v6 }
 0x1bd   : > { %v1012_v50 = vpop.f32.mrf.mxu3  ;;  %v1342_v25 = vmul.f32 %v2331_v45, %v2212_v19 }
 0x1be   : > { %v2931_v52 = vadd.f32 %v830_v42, %v794_v46  ;;  %v1013_v53 = vadd.f32 %v1012_v50, %v910_v49  ;;  %v1303_v46 = vpop.permute.xlu1 %1302  ;;  %v1352_v49 = vpop.permute.xlu2 %1351 }
 0x1bf   : > { %v1395_v27 = vadd.f32 %v1391_v13, %v1342_v25  ;;  %v2335_v50 = vpop.permute.xlu0 %2334  ;;  %vm1311_vm12 = vcmp.eq.s32.totalorder %v2687_v22, %v1303_v46  ;;  %vm1360_vm13 = vcmp.eq.s32.totalorder %v2952_v8, %v1352_v49 }
 0x1c1   : > { %v1401_v31 = vsel %vm1399_vm11, %v1395_v27, 0 }
 0x1c3   : > { %v797_v54 = vpop.f32.mrf.mxu0  ;;  %v838_v63 = vpop.f32.mrf.mxu1 }
 0x1c4   : > { %v798_v59 = vadd.f32 %v797_v54, %v749_v16  ;;  %v918_v55 = vpop.f32.mrf.mxu2 }
 0x1c5   : > { %v1016_v61 = vpop.f32.mrf.mxu3 }
 0x1c6   : > { %v2933_v62 = vadd.f32 %v834_v32, %v798_v59  ;;  %v1017_v39 = vadd.f32 %v1016_v61, %v918_v55  ;;  %v2337_v61 = vunpack.i.h.bf16 %v2335_v50  ;;  %v1306_v17 = vpop.permute.xlu1 %1305 }
 0x1c7   : > { %vm1312_vm14 = vcmp.eq.s32.totalorder %v2687_v22, %v1306_v17 }
 0x1c8   : > { %v2214_v49 = vsel %vm1312_vm14, 1.0, %v2451_v6 }
 0x1cb   : > { %v801_v24 = vpop.f32.mrf.mxu0  ;;  %v842_v60 = vpop.f32.mrf.mxu1 }
 0x1cc   : > { %v802_v0 = vadd.f32 %v801_v24, %v755_v36  ;;  %v926_v1 = vpop.f32.mrf.mxu2  ;;  %v2965_v36 = vand.u32 4294901760, %v1401_v31 }
 0x1cd   : > { %v1020_v2 = vpop.f32.mrf.mxu3 }
 0x1ce   : > { %v2935_v3 = vadd.f32 %v838_v63, %v802_v0  ;;  %v2937_v38 = vadd.f32 %v1020_v2, %v926_v1  ;;  %v2968_v44 = vsub.f32 %v1401_v31, %v2965_v36  ;;  %v2336_v63 = vunpack.i.l.bf16 %v2335_v50 }
 0x1cf   : > { %v2213_v1 = vsel %vm1311_vm12, 1.0, %v2451_v6  ;;  %v2218_v2 = vsel %vm1360_vm13, 1.0, %v2451_v6 }
 0x1d0   : > { %v1423_v55 = vand.u32 4294901760, %v2968_v44  ;;  %v1392_v15 = vmul.f32 %v2337_v61, %v2218_v2 }
 0x1d3   : > { %v805_v4 = vpop.f32.mrf.mxu0  ;;  %v1135_v57 = vpop.f32.mrf.mxu1 }
 0x1d4   : > { %v806_v5 = vadd.f32 %v805_v4, %v761_v43  ;;  %v2939_v33 = vpop.f32.mrf.mxu2 }
 0x1d5   : > { %v2941_v9 = vpop.f32.mrf.mxu3 }
 0x1d6   : > { %v2943_v30 = vadd.f32 %v842_v60, %v806_v5 }
 0x1db   : > { %v1072_v58 = vpop.f32.mrf.mxu0  ;;  %v1141_v26 = vpop.f32.mrf.mxu1 }
 0x1dc   : > { %v942_v48 = vpop.f32.mrf.mxu2  ;;  %v1073_v29 = vadd.f32 %v1072_v58, %v1013_v53  ;;  %v1343_v58 = vmul.f32 %v2336_v63, %v2213_v1 }
 0x1dd   : > { %v1028_v10 = vpop.f32.mrf.mxu3 }
 0x1de   : > { %v2945_v47 = vadd.f32 %v1028_v10, %v942_v48  ;;  %v1136_v35 = vadd.f32 %v1135_v57, %v1073_v29  ;;  %v1424_v10 = vsub.f32 %v2968_v44, %v1423_v55  ;;  %v1396_v19 = vadd.f32 %v1392_v15, %v1343_v58 }
 0x1e3   : > { %v1077_v7 = vpop.f32.mrf.mxu0  ;;  %v1147_v41 = vpop.f32.mrf.mxu1 }
 0x1e4   : > { %v2947_v11 = vpop.f32.mrf.mxu2  ;;  %v1078_v42 = vadd.f32 %v1077_v7, %v1017_v39 }
 0x1e5   : > { %v2949_v14 = vpop.f32.mrf.mxu3 }
 0x1e6   : > { %v1142_v53 = vadd.f32 %v1141_v26, %v1078_v42  ;;  %v1355_v26 = vpop.permute.xlu2 %1354  ;;  %v1033_v15 = vadd.f32 %v2949_v14, %v2947_v11 }
 0x1e7   : > { %vm1361_vm15 = vcmp.eq.s32.totalorder %v2952_v8, %v1355_v26 }
 0x1eb   : > { %v1082_v34 = vpop.f32.mrf.mxu0  ;;  %v1153_v48 = vpop.f32.mrf.mxu1 }
 0x1ec   : > { %v958_v56 = vpop.f32.mrf.mxu2  ;;  %v1083_v4 = vadd.f32 %v1082_v34, %v2937_v38  ;;  %v1025_v38 = vadd.f32 %v2941_v9, %v2939_v33 }
 0x1ed   : > { %v1036_v18 = vpop.f32.mrf.mxu3 }
 0x1ee   : > { %v2958_v23 = vadd.f32 %v1036_v18, %v958_v56  ;;  %v1148_v12 = vadd.f32 %v1147_v41, %v1083_v4  ;;  %v1425_v18 = vand.u32 4294901760, %v1424_v10  ;;  %v1358_v2 = vpop.permute.xlu2 %1357 }
 0x1ef   : > { %vm1362_vm2 = vcmp.eq.s32.totalorder %v2952_v8, %v1358_v2 }
 0x1f0   : > { %v2220_v14 = vsel %vm1362_vm2, 1.0, %v2451_v6 }
 0x1f3   : > { %v1087_v32 = vpop.f32.mrf.mxu0 }
 0x1f4   : > { %v2960_v16 = vpop.f32.mrf.mxu2  ;;  %v1088_v27 = vadd.f32 %v1087_v32, %v1025_v38  ;;  %v2219_v32 = vsel %vm1361_vm15, 1.0, %v2451_v6 }
 0x1f5   : > { %v2962_v28 = vpop.f32.mrf.mxu3 }
 0x1f6   : > { %v1154_v33 = vadd.f32 %v1153_v48, %v1088_v27 }
 0x1fb   : > { %v1092_v20 = vpop.f32.mrf.mxu0 }
 0x1fc   : > { %v1213_v37 = vpop.f32.mrf.mxu2  ;;  %v1093_v61 = vadd.f32 %v1092_v20, %v2945_v47 }
 0x1fd   : > { %v1214_v40 = vadd.f32 %v1213_v37, %v1136_v35  ;;  %v1267_v21 = vpop.f32.mrf.mxu3  ;;  %v2340_v35 = vpop.permute.xlu0 %2339  ;;  %v1563_v37 = vsel %vm1399_vm11, %v1396_v19, 0 }
 0x1fe   : > { %v2989_v41 = vand.u32 4294901760, %v1563_v37  ;;  %v2342_v50 = vunpack.i.h.bf16 %v2340_v35 }
 0x1ff   : > { %v1268_v43 = vadd.f32 %v1267_v21, %v1214_v40  ;;  %v1159_v40 = vpop.f32.mrf.mxu1 }
 0x200   : > { %v2999_v1 = vsub.f32 %v1563_v37, %v2989_v41  ;;  %v1160_v47 = vadd.f32 %v1159_v40, %v1093_v61 }
 0x201   : > { %v2972_v54 = vand.u32 4294901760, %v1268_v43 }
 0x203   : > { %v1451_v5 = vsub.f32 %v1268_v43, %v2972_v54  ;;  %v1097_v63 = vpop.f32.mrf.mxu0 }
 0x204   : > { %v1217_v59 = vpop.f32.mrf.mxu2 }
 0x205   : > { %v1218_v24 = vadd.f32 %v1217_v59, %v1142_v53  ;;  %v1271_v0 = vpop.f32.mrf.mxu3  ;;  %v1452_v56 = vand.u32 4294901760, %v1451_v5  ;;  %v2341_v53 = vunpack.i.l.bf16 %v2340_v35  ;;  %v1309_v59 = vpop.permute.xlu1 %1308 }
 0x206   : > { %vm1313_vm0 = vcmp.eq.s32.totalorder %v2687_v22, %v1309_v59  ;;  %v2345_v48 = vpop.permute.xlu0 %2344 }
 0x207   : > { %v1272_v60 = vadd.f32 %v1271_v0, %v1218_v24  ;;  %v1453_v34 = vsub.f32 %v1451_v5, %v1452_v56  ;;  %v2346_v17 = vunpack.i.l.bf16 %v2345_v48  ;;  %v2215_v11 = vsel %vm1313_vm0, 1.0, %v2451_v6 }
 0x209   : > { %v1417_v51 = vand.u32 4294901760, %v1272_v60  ;;  %v1454_v21 = vand.u32 4294901760, %v1453_v34 }
 0x20b   : > { %v1445_v57 = vsub.f32 %v1272_v60, %v1417_v51  ;;  %1418 = vmatpush.msrb.mxu0 %v1417_v51  ;;  %v1393_v60 = vmul.f32 %v2342_v50, %v2219_v32  ;;  %v1102_v6 = vpop.f32.mrf.mxu0 }
 0x20c   : > { %v1221_v45 = vpop.f32.mrf.mxu2 }
 0x20d   : > { %v1446_v7 = vand.u32 4294901760, %v1445_v57  ;;  %v1222_v25 = vadd.f32 %v1221_v45, %v1148_v12  ;;  %1420 = vmatpush.msrb.mxu0 %v2972_v54  ;;  %v1275_v13 = vpop.f32.mrf.mxu3  ;;  %v1165_v12 = vpop.f32.mrf.mxu1 }
 0x20e   : > { %1426 = vmatmul.f32.vlgmr.msrb.gmra.mxu0 %v1425_v18 }
 0x20f   : > { %v1447_v29 = vsub.f32 %v1445_v57, %v1446_v7  ;;  %v1276_v31 = vadd.f32 %v1275_v13, %v1222_v25  ;;  %1477 = vmatpush.msra.mxu0 %v1445_v57  ;;  %v1345_v13 = vmul.f32 %v2346_v17, %v2215_v11 }
 0x211   : > { %1480 = vmatpush.msra.mxu0 %v1451_v5  ;;  %v1448_v39 = vand.u32 4294901760, %v1447_v29  ;;  %v2987_v9 = vand.u32 4294901760, %v1276_v31  ;;  %v1344_v5 = vmul.f32 %v2341_v53, %v2214_v49 }
 0x213   : > { %1529 = vmatpush.msrb.mxu0 %v1446_v7  ;;  %1449 = vmatpush.msrb.mxu1 %v1448_v39  ;;  %v1613_v24 = vsub.f32 %v1276_v31, %v2987_v9  ;;  %v1397_v38 = vadd.f32 %v1393_v60, %v1344_v5  ;;  %v1107_v32 = vpop.f32.mrf.mxu0 }
 0x214   : > { %v1225_v42 = vpop.f32.mrf.mxu2 }
 0x215   : > { %1533 = vmatpush.msrb.mxu0 %v1452_v56  ;;  %v1226_v43 = vadd.f32 %v1225_v42, %v1154_v33  ;;  %1455 = vmatpush.msrb.mxu1 %v1454_v21  ;;  %v1279_v46 = vpop.f32.mrf.mxu3  ;;  %v1614_v58 = vand.u32 4294901760, %v1613_v24  ;;  %v1585_v56 = vand.u32 4294901760, %v2999_v1  ;;  %v1171_v33 = vpop.f32.mrf.mxu1  ;;  %v1103_v21 = vadd.f32 %v1102_v6, %v2958_v23 }
 0x216   : > { %1457 = vmatmul.f32.vlgmr.msrb.gmra.mxu1 %v2965_v36  ;;  %1483 = vmatmul.f32.vlgmr.msra.gmra.mxu0 %v2968_v44  ;;  %v1725_v44 = vsel %vm1399_vm11, %v1397_v38, 0  ;;  %v1041_v23 = vadd.f32 %v2962_v28, %v2960_v16 }
 0x217   : > { %v1280_v0 = vadd.f32 %v1279_v46, %v1226_v43  ;;  %1502 = vmatpush.msra.mxu1 %v1417_v51  ;;  %v1615_v25 = vsub.f32 %v1613_v24, %v1614_v58  ;;  %v1586_v22 = vsub.f32 %v2999_v1, %v1585_v56  ;;  %v3032_v35 = vand.u32 4294901760, %v1725_v44 }
 0x218   : > { %v1172_v53 = vadd.f32 %v1171_v33, %v1103_v21 }
 0x219   : > { %v3001_v4 = vand.u32 4294901760, %v1280_v0  ;;  %1504 = vmatpush.msra.mxu1 %v2972_v54  ;;  %v1616_v29 = vand.u32 4294901760, %v1615_v25  ;;  %v1587_v34 = vand.u32 4294901760, %v1586_v22  ;;  %v1746_v46 = vsub.f32 %v1725_v44, %v3032_v35 }
 0x21b   : > { %1554 = vmatpush.msrb.mxu1 %v1417_v51  ;;  %v1607_v10 = vsub.f32 %v1280_v0, %v3001_v4  ;;  %1580 = vmatpush.msra.mxu0 %v3001_v4  ;;  %v2347_v51 = vunpack.i.h.bf16 %v2345_v48 }
 0x21c   : > { %1716 = vmatpush.msrb.mxu3 %v3001_v4  ;;  %v1229_v57 = vpop.f32.mrf.mxu2 }
 0x21d   : > { %1556 = vmatpush.msrb.mxu1 %v2972_v54  ;;  %v1608_v45 = vand.u32 4294901760, %v1607_v10  ;;  %v1230_v18 = vadd.f32 %v1229_v57, %v1160_v47  ;;  %1582 = vmatpush.msra.mxu0 %v2987_v9  ;;  %v1283_v19 = vpop.f32.mrf.mxu3  ;;  %v1098_v54 = vadd.f32 %v1097_v63, %v1033_v15  ;;  %v1394_v8 = vmul.f32 %v2347_v51, %v2220_v14  ;;  %v1177_v28 = vpop.f32.mrf.mxu1 }
 0x21e   : > { %1718 = vmatpush.msrb.mxu3 %v2987_v9  ;;  %1508 = vmatmul.f32.vlgmr.msra.gmra.mxu1 %v1423_v55 }
 0x21f   : > { %1535 = vmatmul.f32.vlgmr.msrb.gmra.mxu0 %v2965_v36  ;;  %v1609_v20 = vsub.f32 %v1607_v10, %v1608_v45  ;;  %v1284_v7 = vadd.f32 %v1283_v19, %v1230_v18  ;;  %1720 = vmatmul.f32.vlgmr.msrb.gmra.mxu3 %v2989_v41  ;;  %v1166_v55 = vadd.f32 %v1165_v12, %v1098_v54 }
 0x220   : > { %1639 = vmatpush.msrb.mxu0 %v1607_v10  ;;  %1691 = vmatpush.msrb.mxu2 %v1608_v45  ;;  %v1398_v37 = vadd.f32 %v1394_v8, %v1345_v13 }
 0x221   : > { %v1610_v26 = vand.u32 4294901760, %v1609_v20  ;;  %v3029_v27 = vand.u32 4294901760, %v1284_v7 }
 0x222   : > { %1642 = vmatpush.msrb.mxu0 %v1613_v24  ;;  %1695 = vmatpush.msrb.mxu2 %v1614_v58  ;;  %v1887_v49 = vsel %vm1399_vm11, %v1398_v37, 0 }
 0x223   : > { %1697 = vmatmul.f32.vlgmr.msrb.gmra.mxu2 %v2989_v41  ;;  %1611 = vmatpush.msra.mxu1 %v1610_v26  ;;  %v1775_v42 = vsub.f32 %v1284_v7, %v3029_v27  ;;  %v3041_v61 = vand.u32 4294901760, %v1887_v49 }
 0x224   : > { %v1233_v31 = vpop.f32.mrf.mxu2 }
 0x225   : > { %v1234_v39 = vadd.f32 %v1233_v31, %v1166_v55  ;;  %1617 = vmatpush.msra.mxu1 %v1616_v29  ;;  %v1287_v40 = vpop.f32.mrf.mxu3  ;;  %v1908_v16 = vsub.f32 %v1887_v49, %v3041_v61 }
 0x226   : > { %1558 = vmatmul.f32.vlgmr.msrb.gmra.mxu1 %v2965_v36  ;;  %v1776_v36 = vand.u32 4294901760, %v1775_v42 }
 0x227   : > { %1588 = vmatmul.f32.vlgmr.msra.gmra.mxu0 %v1587_v34  ;;  %v1288_v43 = vadd.f32 %v1287_v40, %v1234_v39  ;;  %1664 = vmatpush.msrb.mxu1 %v3001_v4  ;;  %v1747_v4 = vand.u32 4294901760, %v1746_v46  ;;  %v1909_v57 = vand.u32 4294901760, %v1908_v16 }
 0x228   : > { %v1777_v48 = vsub.f32 %v1775_v42, %v1776_v36 }
 0x229   : > { %v1741_v50 = vand.u32 4294901760, %v1288_v43  ;;  %1666 = vmatpush.msrb.mxu1 %v2987_v9  ;;  %v1108_v9 = vadd.f32 %v1107_v32, %v1041_v23  ;;  %v1748_v10 = vsub.f32 %v1746_v46, %v1747_v4  ;;  %v1910_v38 = vsub.f32 %v1908_v16, %v1909_v57 }
 0x22a   : > { %v1778_v12 = vand.u32 4294901760, %v1777_v48 }
 0x22b   : > { %v1769_v59 = vsub.f32 %v1288_v43, %v1741_v50  ;;  %1742 = vmatpush.msra.mxu0 %v1741_v50  ;;  %1826 = vmatpush.msra.mxu3 %v1741_v50  ;;  %v1178_v58 = vadd.f32 %v1177_v28, %v1108_v9  ;;  %v1749_v45 = vand.u32 4294901760, %v1748_v10  ;;  %v1911_v20 = vand.u32 4294901760, %v1910_v38 }
 0x22c   : > { %v1237_v63 = vpop.f32.mrf.mxu2 }
 0x22d   : > { %v1770_v24 = vand.u32 4294901760, %v1769_v59  ;;  %v1238_v0 = vadd.f32 %v1237_v63, %v1172_v53  ;;  %1744 = vmatpush.msra.mxu0 %v3029_v27  ;;  %1801 = vmatpush.msra.mxu2 %v1769_v59  ;;  %v1291_v2 = vpop.f32.mrf.mxu3 }
 0x22e   : > { %1828 = vmatpush.msra.mxu3 %v3029_v27  ;;  %1619 = vmatmul.f32.vlgmr.msra.gmra.mxu1 %v2989_v41 }
 0x22f   : > { %v1771_v5 = vsub.f32 %v1769_v59, %v1770_v24  ;;  %v1292_v60 = vadd.f32 %v1291_v2, %v1238_v0  ;;  %1645 = vmatmul.f32.vlgmr.msrb.gmra.mxu0 %v2999_v1  ;;  %1832 = vmatmul.f32.vlgmr.msra.gmra.mxu3 %v1747_v4 }
 0x230   : > { %1804 = vmatpush.msra.mxu2 %v1775_v42  ;;  %1853 = vmatpush.msrb.mxu0 %v1770_v24 }
 0x231   : > { %1807 = vmatmul.f32.vlgmr.msra.gmra.mxu2 %v1746_v46  ;;  %v1772_v47 = vand.u32 4294901760, %v1771_v5  ;;  %v1905_v15 = vand.u32 4294901760, %v1292_v60 }
 0x232   : > { %1857 = vmatpush.msrb.mxu0 %v1776_v36 }
 0x233   : > { %1773 = vmatpush.msra.mxu1 %v1772_v47  ;;  %v1937_v18 = vsub.f32 %v1292_v60, %v1905_v15 }
 0x234   : > { %v1241_v41 = vpop.f32.mrf.mxu2 }
 0x235   : > { %v1242_v51 = vadd.f32 %v1241_v41, %v1178_v58  ;;  %1779 = vmatpush.msra.mxu1 %v1778_v12  ;;  %v1295_v17 = vpop.f32.mrf.mxu3  ;;  %v1938_v54 = vand.u32 4294901760, %v1937_v18 }
 0x236   : > { %1670 = vmatmul.f32.vlgmr.msrb.gmra.mxu1 %v1585_v56 }
 0x237   : > { %v1296_v19 = vadd.f32 %v1295_v17, %v1242_v51  ;;  %1750 = vmatmul.f32.vlgmr.msra.gmra.mxu0 %v1749_v45  ;;  %1878 = vmatpush.msrb.mxu1 %v1741_v50  ;;  %v1939_v56 = vsub.f32 %v1937_v18, %v1938_v54 }
 0x239   : > { %v1903_v11 = vand.u32 4294901760, %v1296_v19  ;;  %1880 = vmatpush.msrb.mxu1 %v3029_v27  ;;  %v1940_v22 = vand.u32 4294901760, %v1939_v56 }
 0x23b   : > { %v1931_v14 = vsub.f32 %v1296_v19, %v1903_v11  ;;  %1904 = vmatpush.msrb.mxu2 %v1903_v11 }
 0x23d   : > { %v1932_v7 = vand.u32 4294901760, %v1931_v14  ;;  %1906 = vmatpush.msrb.mxu2 %v1905_v15  ;;  %1963 = vmatpush.msra.mxu0 %v1931_v14 }
 0x23e   : > { %1781 = vmatmul.f32.vlgmr.msra.gmra.mxu1 %v3032_v35  ;;  %1912 = vmatmul.f32.vlgmr.msrb.gmra.mxu2 %v1911_v20 }
 0x23f   : > { %v1933_v1 = vsub.f32 %v1931_v14, %v1932_v7  ;;  %1859 = vmatmul.f32.vlgmr.msrb.gmra.mxu0 %v3032_v35  ;;  %1988 = vmatpush.msra.mxu1 %v1903_v11 }
 0x240   : > { %1966 = vmatpush.msra.mxu0 %v1937_v18  ;;  %2015 = vmatpush.msra.mxu2 %v1932_v7 }
 0x241   : > { %1990 = vmatpush.msra.mxu1 %v1905_v15  ;;  %v1934_v25 = vand.u32 4294901760, %v1933_v1 }
 0x242   : > { %2019 = vmatpush.msra.mxu2 %v1938_v54 }
 0x243   : > { %1935 = vmatpush.msrb.mxu3 %v1934_v25 }
 0x245   : > { %1941 = vmatpush.msrb.mxu3 %v1940_v22 }
 0x246   : > { %1882 = vmatmul.f32.vlgmr.msrb.gmra.mxu1 %v3032_v35  ;;  %1943 = vmatmul.f32.vlgmr.msrb.gmra.mxu3 %v3041_v61 }
 0x247   : > { %1969 = vmatmul.f32.vlgmr.msra.gmra.mxu0 %v1908_v16  ;;  %2021 = vmatmul.f32.vlgmr.msra.gmra.mxu2 %v3041_v61 }
 0x248   : > { %2040 = vmatpush.msra.mxu3 %v1903_v11 }
 0x24a   : > { %2042 = vmatpush.msra.mxu3 %v1905_v15 }
 0x24e   : > { %1994 = vmatmul.f32.vlgmr.msra.gmra.mxu1 %v1909_v57  ;;  %2044 = vmatmul.f32.vlgmr.msra.gmra.mxu3 %v3041_v61 }
 0x28b   : > { %v1427_v13 = vpop.f32.mrf.mxu0 }
 0x293   : > { %v1458_v8 = vpop.f32.mrf.mxu1  ;;  %v1484_v6 = vpop.f32.mrf.mxu0 }
 0x294   : > { %v1459_v26 = vadd.f32 %v1458_v8, %v1427_v13 }
 0x296   : > { %v1485_v27 = vadd.f32 %v1484_v6, %v1459_v26 }
 0x29b   : > { %v1509_v44 = vpop.f32.mrf.mxu1 }
 0x29c   : > { %v1536_v55 = vpop.f32.mrf.mxu0  ;;  %v1510_v29 = vadd.f32 %v1509_v44, %v1485_v27 }
 0x29e   : > { %v1537_v31 = vadd.f32 %v1536_v55, %v1510_v29 }
 0x2a2   : > { %v1721_v53 = vpop.f32.mrf.mxu3 }
 0x2a3   : > { %v1559_v34 = vpop.f32.mrf.mxu1 }
 0x2a4   : > { %v1589_v35 = vpop.f32.mrf.mxu0  ;;  %v1560_v37 = vadd.f32 %v1559_v34, %v1537_v31 }
 0x2a6   : > { %v2048_v39 = vadd.f32 %v1560_v37, %v2931_v52  ;;  %v1698_v49 = vpop.f32.mrf.mxu2 }
 0x2a8   : > { %2052 = vst [vmem:[%s3063_s25] sm:$0xff] %v2048_v39 }
 0x2ab   : > { %v1620_v40 = vpop.f32.mrf.mxu1 }
 0x2ac   : > { %v1646_v33 = vpop.f32.mrf.mxu0  ;;  %v1621_v21 = vadd.f32 %v1620_v40, %v1589_v35 }
 0x2ae   : > { %v1647_v42 = vadd.f32 %v1646_v33, %v1621_v21 }
 0x2b2   : > { %v1833_v24 = vpop.f32.mrf.mxu3 }
 0x2b3   : > { %v1671_v43 = vpop.f32.mrf.mxu1 }
 0x2b4   : > { %v1672_v46 = vadd.f32 %v1671_v43, %v1647_v42  ;;  %v1751_v32 = vpop.f32.mrf.mxu0  ;;  %v1808_v23 = vpop.f32.mrf.mxu2 }
 0x2b6   : > { %v1699_v50 = vadd.f32 %v1698_v49, %v1672_v46 }
 0x2b8   : > { %v1722_v59 = vadd.f32 %v1721_v53, %v1699_v50 }
 0x2ba   : > { %v2049_v36 = vadd.f32 %v1722_v59, %v2933_v62 }
 0x2bb   : > { %v1782_v52 = vpop.f32.mrf.mxu1 }
 0x2bc   : > { %2053 = vst [vmem:[%s3063_s25 + $0x8] sm:$0xff] %v2049_v36  ;;  %v1783_v61 = vadd.f32 %v1782_v52, %v1751_v32  ;;  %v1860_v2 = vpop.f32.mrf.mxu0 }
 0x2be   : > { %v1809_v63 = vadd.f32 %v1808_v23, %v1783_v61 }
 0x2c0   : > { %v1834_v0 = vadd.f32 %v1833_v24, %v1809_v63 }
 0x2c1   : > { %v1913_v60 = vpop.f32.mrf.mxu2 }
 0x2c2   : > { %v1861_v4 = vadd.f32 %v1860_v2, %v1834_v0 }
 0x2c3   : > { %v1883_v9 = vpop.f32.mrf.mxu1 }
 0x2c4   : > { %v1884_v5 = vadd.f32 %v1883_v9, %v1861_v4  ;;  %v1970_v62 = vpop.f32.mrf.mxu0 }
 0x2c6   : > { %v2050_v48 = vadd.f32 %v1884_v5, %v2935_v3 }
 0x2c8   : > { %2054 = vst [vmem:[%s3063_s25 + $0x10] sm:$0xff] %v2050_v48 }
 0x2c9   : > { %v1944_v16 = vpop.f32.mrf.mxu3 }
 0x2ca   : > { %v1945_v28 = vadd.f32 %v1944_v16, %v1913_v60  ;;  %v2022_v15 = vpop.f32.mrf.mxu2 }
 0x2cb   : > { %v1995_v10 = vpop.f32.mrf.mxu1 }
 0x2cc   : > { %v1971_v47 = vadd.f32 %v1970_v62, %v1945_v28 }
 0x2ce   : > { %v1996_v58 = vadd.f32 %v1995_v10, %v1971_v47 }
 0x2d0   : > { %v2023_v12 = vadd.f32 %v2022_v15, %v1996_v58 }
 0x2d1   : > { %v2045_v41 = vpop.f32.mrf.mxu3 }
 0x2d2   : > { %v2046_v3 = vadd.f32 %v2045_v41, %v2023_v12 }
 0x2d4   : > { %v2051_v57 = vadd.f32 %v2046_v3, %v2943_v30 }
 0x2d6   : > { %2055 = vst [vmem:[%s3063_s25 + $0x18] sm:$0xff] %v2051_v57 }
 0x2d7   : > { %2405 = shalt.err (!%p2402_p8)
}
 0x2d8   : > { %s2455_s17 = smov 128   ;;  %s2456_s23 = smov 8  }
 0x2d9   : > { %2232 = dma.vmem_to_hbm [thread:$0]  (%p2525_p5), %s2070_s8, 512, %s2072_s9, %s2057_s22, %s2455_s17, %s2455_s17, %s2456_s23  }
 0x2da PF: > { %p2244_p9 = scmp.ge.s32.totalorder %s2444_s21, 2  ;;  %s2086_s25 = sand.u32 1, %s2432_s18  }
 0x2db   : > { %s2087_s26 = scalar_lea.sflag [#allocation4], %s2086_s25 }
 0x2dc   : > { %p2239_p10 = pnand %p2244_p9, %p2529_p6 }
 0x2de   : > { %p2240_p11 = pneg %p2239_p10 }
 0x2e0   : > { %2427 = dma.done.wait (%p2240_p11), %s2087_s26, 512  }
 0x2e1   : > { %2429 = vsyncadd (%p2240_p11), %s2087_s26, 4294966784  ;;  %p16_p12 = scmp.ge.s32.totalorder %s2512_s24, 4   ;;  %s3114_s18 = smov %s2436_s19 }
 0x2e2   : > { %s3115_s19 = smov %s2440_s20  ;;  %s3116_s20 = smov %s2523_s27 }
 0x2e3   : > { %s3117_s21 = smov %s2512_s24  ;;  %18 = sbr.rel (!%p16_p12) target bundleno = 4 (0x4), region = 86 }
 0x2e8   :  { %2093 = vsyncpa [#allocation3], 1 }
 0x2e9   :  { %2095 = vsyncpa [#allocation3 + $0x1], 1 }
 0x2ea   :  { %2096 = vsyncpa [#allocation4], 1 }
 0x2eb   :  { %2098 = vsyncpa [#allocation4 + $0x1], 1 }

</bundles_post_ra>
